<compile_context>
chip_gen: v7x
topology: tpu7x:2x2x1
jax: 0.10.0
libtpu: 0.0.40
codegen_flags: <defaults>
</compile_context>

<pallas_src>
import functools
import math

import jax
import jax.numpy as jnp
from jax.experimental import pallas as pl
from jax.experimental.pallas import tpu as pltpu


# ----------------------------------------------------------------------------
# Fused Pallas kernel: per-head projections + attention + output accumulation
# ----------------------------------------------------------------------------

def _fused_attn_kernel(q_ref, k_ref, v_ref, w_in_ref, b_in_ref, wo_ref, bo_ref,
                       o_ref, *, batch, n_q, n_k, num_heads_total):
    Ht = num_heads_total
    q2d = q_ref[...]          # (B*Nq, E)  -- all batches flattened into rows
    k2d = k_ref[...]          # (B*Nk, E)
    v2d = v_ref[...]          # (B*Nk, E)

    y = [None] * batch        # per-batch (Nq, E) f32 accumulators (SSA values)

    # Ht and B are tiny -> fully unrolled static loops.
    for h in range(Ht):
        # Per-head projections over ALL batch rows at once (best MXU M-fill).
        # w_in is stacked head-major: [0:Ht]=Q (scale folded), [Ht:2Ht]=K, [2Ht:3Ht]=V.
        qh = jnp.dot(q2d, w_in_ref[h],
                     preferred_element_type=jnp.float32) + b_in_ref[h]           # (B*Nq, c)
        kh = jnp.dot(k2d, w_in_ref[Ht + h],
                     preferred_element_type=jnp.float32) + b_in_ref[Ht + h]      # (B*Nk, c)
        vh = jnp.dot(v2d, w_in_ref[2 * Ht + h],
                     preferred_element_type=jnp.float32) + b_in_ref[2 * Ht + h]  # (B*Nk, c)
        wo_h = wo_ref[h]      # (c, E) -- leading-axis index, no relayout

        for b in range(batch):
            # Sublane (row) slices at multiples of 8 -> tile-aligned, free.
            qb = qh[b * n_q:(b + 1) * n_q]        # (Nq, c)
            kb = kh[b * n_k:(b + 1) * n_k]        # (Nk, c)
            vb = vh[b * n_k:(b + 1) * n_k]        # (Nk, c)

            # scores = qb @ kb^T (scale already folded into Wq/bq).
            s = jax.lax.dot_general(qb, kb, (((1,), (1,)), ((), ())),
                                    preferred_element_type=jnp.float32)  # (Nq, Nk)
            m = jnp.max(s, axis=-1, keepdims=True)
            e = jnp.exp(s - m)
            p = e * pl.reciprocal(jnp.sum(e, axis=-1, keepdims=True), approx=True)

            ob = jnp.dot(p, vb, preferred_element_type=jnp.float32)      # (Nq, c)
            # Accumulate the fused output projection per head: no lane-dim
            # concat, no lane-offset weight slices.
            contrib = jnp.dot(ob, wo_h, preferred_element_type=jnp.float32)  # (Nq, E)
            y[b] = contrib if y[b] is None else y[b] + contrib

    bo = bo_ref[...]          # (1, E)
    for b in range(batch):
        o_ref[b * n_q:(b + 1) * n_q, :] = y[b] + bo


def extra_head_attention(folded, q, k, v, *, num_heads, extra_num_heads):
    """Fused forward. `folded` comes from fold_params()."""
    B, Nq, E = q.shape
    Nk = k.shape[1]
    Ht = num_heads + extra_num_heads
    c = folded["w_in"].shape[-1]

    kernel = functools.partial(_fused_attn_kernel,
                               batch=B, n_q=Nq, n_k=Nk, num_heads_total=Ht)

    # Advisory cost estimate for XLA's scheduler.
    flops = int(2 * B * Nq * E * c * Ht            # Q projections
                + 4 * B * Nk * E * c * Ht          # K, V projections
                + 4 * B * Ht * Nq * Nk * c         # scores + p @ v
                + 2 * B * Ht * Nq * c * E)         # output projection
    transcendentals = int(B * Ht * Nq * Nk)        # exps
    bytes_accessed = int(4 * (B * Nq * E + 2 * B * Nk * E          # activations in
                              + 3 * Ht * E * c + 3 * Ht * c        # w_in, b_in
                              + Ht * c * E + E                     # wo, bo
                              + B * Nq * E))                       # output

    out2d = pl.pallas_call(
        kernel,
        out_shape=jax.ShapeDtypeStruct((B * Nq, E), jnp.float32),
        grid=(1,),
        in_specs=[
            pl.BlockSpec((B * Nq, E), lambda i: (0, 0)),
            pl.BlockSpec((B * Nk, E), lambda i: (0, 0)),
            pl.BlockSpec((B * Nk, E), lambda i: (0, 0)),
            pl.BlockSpec((3 * Ht, E, c), lambda i: (0, 0, 0)),   # stacked q/k/v weights
            pl.BlockSpec((3 * Ht, 1, c), lambda i: (0, 0, 0)),   # stacked q/k/v biases
            pl.BlockSpec((Ht, c, E), lambda i: (0, 0, 0)),       # fused output weights
            pl.BlockSpec((1, E), lambda i: (0, 0)),              # fused output bias
        ],
        out_specs=pl.BlockSpec((B * Nq, E), lambda i: (0, 0)),
        compiler_params=pltpu.CompilerParams(
            dimension_semantics=("arbitrary",)),
        cost_estimate=pl.CostEstimate(flops=flops,
                                      transcendentals=transcendentals,
                                      bytes_accessed=bytes_accessed),
    )(q.reshape(B * Nq, E), k.reshape(B * Nk, E), v.reshape(B * Nk, E),
      folded["w_in"], folded["b_in"], folded["wo"], folded["bo"])

    return out2d.reshape(B, Nq, E)


# ----------------------------------------------------------------------------
# Parameters (PyTorch nn.Linear-style init) + algebraic folding (head-major)
# ----------------------------------------------------------------------------

def init_params(key, embedding_dim, num_heads, downsample_rate=1, extra_num_heads=1):
    internal_dim = embedding_dim // downsample_rate
    assert internal_dim % num_heads == 0
    c_per_head = internal_dim // num_heads
    extra_channel = extra_num_heads * c_per_head

    names_and_dims = {
        "q": (embedding_dim, internal_dim),
        "k": (embedding_dim, internal_dim),
        "v": (embedding_dim, internal_dim),
        "o": (internal_dim, embedding_dim),
        "eq": (embedding_dim, extra_channel),
        "ek": (embedding_dim, extra_channel),
        "ev": (embedding_dim, extra_channel),
        "eo": (extra_channel, embedding_dim),
    }
    params = {}
    keys = jax.random.split(key, 2 * len(names_and_dims))
    for i, (name, (fin, fout)) in enumerate(names_and_dims.items()):
        bound = 1.0 / math.sqrt(fin)
        params[name + "_w"] = jax.random.uniform(
            keys[2 * i], (fin, fout), jnp.float32, -bound, bound)
        params[name + "_b"] = jax.random.uniform(
            keys[2 * i + 1], (fout,), jnp.float32, -bound, bound)
    return params


def fold_params(params, *, num_heads, extra_num_heads, c_per_head):
    """Fold extra projections into the main ones, reshape head-major, fold the
    1/sqrt(c) attention scale into Wq/bq, and stack q/k/v operands."""
    Ht = num_heads + extra_num_heads
    c = c_per_head
    scale = 1.0 / math.sqrt(c)

    def head_major_w(w_main, w_extra, mult=1.0):
        w = jnp.concatenate([w_main, w_extra], axis=1) * mult       # (E, Ht*c)
        e = w.shape[0]
        return w.reshape(e, Ht, c).transpose(1, 0, 2)               # (Ht, E, c)

    def head_major_b(b_main, b_extra, mult=1.0):
        b = jnp.concatenate([b_main, b_extra], axis=0) * mult       # (Ht*c,)
        return b.reshape(Ht, 1, c)                                  # (Ht, 1, c)

    wq = head_major_w(params["q_w"], params["eq_w"], scale)
    wk = head_major_w(params["k_w"], params["ek_w"])
    wv = head_major_w(params["v_w"], params["ev_w"])
    bq = head_major_b(params["q_b"], params["eq_b"], scale)
    bk = head_major_b(params["k_b"], params["ek_b"])
    bv = head_major_b(params["v_b"], params["ev_b"])

    wo = jnp.concatenate([params["o_w"], params["eo_w"]], axis=0)   # (Ht*c, E)
    e = wo.shape[1]
    wo = wo.reshape(Ht, c, e)                                       # (Ht, c, E)
    bo = (params["o_b"] + params["eo_b"]).reshape(1, e)             # (1, E)

    return {
        "w_in": jnp.concatenate([wq, wk, wv], axis=0),   # (3*Ht, E, c)
        "b_in": jnp.concatenate([bq, bk, bv], axis=0),   # (3*Ht, 1, c)
        "wo": wo,
        "bo": bo,
    }


# ----------------------------------------------------------------------------
# Pure-JAX reference (mirrors the PyTorch module, unfolded)
# ----------------------------------------------------------------------------

def _separate_heads(x, num_heads):
    b, n, c = x.shape
    return x.reshape(b, n, num_heads, c // num_heads).transpose(0, 2, 1, 3)


def _recombine_heads(x):
    b, nh, nt, c = x.shape
    return x.transpose(0, 2, 1, 3).reshape(b, nt, nh * c)


def reference(params, q, k, v, *, num_heads, extra_num_heads):
    lin = lambda x, w, b: x @ w + b
    q_extra = lin(q, params["eq_w"], params["eq_b"])
    k_extra = lin(k, params["ek_w"], params["ek_b"])
    v_extra = lin(v, params["ev_w"], params["ev_b"])
    qp = lin(q, params["q_w"], params["q_b"])
    kp = lin(k, params["k_w"], params["k_b"])
    vp = lin(v, params["v_w"], params["v_b"])
    cq = jnp.concatenate([qp, q_extra], axis=-1)
    ck = jnp.concatenate([kp, k_extra], axis=-1)
    cv = jnp.concatenate([vp, v_extra], axis=-1)
    Ht = num_heads + extra_num_heads
    qh = _separate_heads(cq, Ht)
    kh = _separate_heads(ck, Ht)
    vh = _separate_heads(cv, Ht)
    c = qh.shape[-1]
    attn = jnp.einsum("bhqc,bhkc->bhqk", qh, kh) / math.sqrt(c)
    attn = jax.nn.softmax(attn, axis=-1)
    out = jnp.einsum("bhqk,bhkc->bhqc", attn, vh)
    origin = _recombine_heads(out[:, :num_heads])
    extra = _recombine_heads(out[:, num_heads:])
    return lin(origin, params["o_w"], params["o_b"]) + lin(
        extra, params["eo_w"], params["eo_b"])


# ----------------------------------------------------------------------------

if __name__ == "__main__":
    B = 2
    Nq, Nk = 8, 16
    E = 32
    num_heads = 4
    downsample_rate = 1
    extra_num_heads = 1
    c_per_head = (E // downsample_rate) // num_heads

    key = jax.random.PRNGKey(0)
    kp_, kq_, kk_, kv_ = jax.random.split(key, 4)
    params = init_params(kp_, E, num_heads, downsample_rate, extra_num_heads)
    q = jax.random.normal(kq_, (B, Nq, E), jnp.float32)
    k = jax.random.normal(kk_, (B, Nk, E), jnp.float32)
    v = jax.random.normal(kv_, (B, Nk, E), jnp.float32)

    folded = fold_params(params, num_heads=num_heads,
                         extra_num_heads=extra_num_heads, c_per_head=c_per_head)
    out = extra_head_attention(
        folded, q, k, v, num_heads=num_heads, extra_num_heads=extra_num_heads)
    out = jax.block_until_ready(out)

    ref = reference(
        params, q, k, v, num_heads=num_heads, extra_num_heads=extra_num_heads)
    assert out.shape == (B, Nq, E), out.shape
    # Tolerance loosened slightly vs. exact f32: pl.reciprocal(approx=True) in
    # the softmax denominator has ~1e-4 relative error, and folding the
    # 1/sqrt(c) scale into Wq changes f32 rounding order.
    max_err = float(jnp.max(jnp.abs(out - ref)))
    assert jnp.allclose(out, ref, rtol=2e-3, atol=2e-3), max_err
    print("KERNEL_OK")
</pallas_src>

<mosaic_0001>
module attributes {stable_mosaic.version = 11 : i64} {
  func.func @_fused_attn_kernel(%arg0: i32, %arg1: memref<16x32xf32, #tpu.memory_space<vmem>>, %arg2: memref<32x32xf32, #tpu.memory_space<vmem>>, %arg3: memref<32x32xf32, #tpu.memory_space<vmem>>, %arg4: memref<15x32x8xf32, #tpu.memory_space<vmem>>, %arg5: memref<15x1x8xf32, #tpu.memory_space<vmem>>, %arg6: memref<5x8x32xf32, #tpu.memory_space<vmem>>, %arg7: memref<1x32xf32, #tpu.memory_space<vmem>>, %arg8: memref<16x32xf32, #tpu.memory_space<vmem>>) attributes {dimension_semantics = [#tpu.dimension_semantics<arbitrary>], iteration_bounds = array<i64: 1>, scalar_prefetch = 0 : i64, scratch_operands = 0 : i64, tpu.core_type = #tpu.core_type<tc>, window_params = [{pipeline_mode = #tpu.pipeline_mode<synchronous>, transform_indices = @transform_0, window_bounds = array<i64: 16, 32>}, {pipeline_mode = #tpu.pipeline_mode<synchronous>, transform_indices = @transform_1, window_bounds = array<i64: 32, 32>}, {pipeline_mode = #tpu.pipeline_mode<synchronous>, transform_indices = @transform_2, window_bounds = array<i64: 32, 32>}, {pipeline_mode = #tpu.pipeline_mode<synchronous>, transform_indices = @transform_3, window_bounds = array<i64: 15, 32, 8>}, {pipeline_mode = #tpu.pipeline_mode<synchronous>, transform_indices = @transform_4, window_bounds = array<i64: 15, 1, 8>}, {pipeline_mode = #tpu.pipeline_mode<synchronous>, transform_indices = @transform_5, window_bounds = array<i64: 5, 8, 32>}, {pipeline_mode = #tpu.pipeline_mode<synchronous>, transform_indices = @transform_6, window_bounds = array<i64: 1, 32>}, {pipeline_mode = #tpu.pipeline_mode<synchronous>, transform_indices = @transform_7, window_bounds = array<i64: 16, 32>}]} {
    %c0 = arith.constant 0 : index
    %c0_0 = arith.constant 0 : index
    %0 = vector.load %arg1[%c0, %c0_0] : memref<16x32xf32, #tpu.memory_space<vmem>>, vector<16x32xf32>
    %c0_1 = arith.constant 0 : index
    %c0_2 = arith.constant 0 : index
    %1 = vector.load %arg2[%c0_1, %c0_2] : memref<32x32xf32, #tpu.memory_space<vmem>>, vector<32x32xf32>
    %c0_3 = arith.constant 0 : index
    %c0_4 = arith.constant 0 : index
    %2 = vector.load %arg3[%c0_3, %c0_4] : memref<32x32xf32, #tpu.memory_space<vmem>>, vector<32x32xf32>
    %c0_5 = arith.constant 0 : index
    %c0_6 = arith.constant 0 : index
    %c0_7 = arith.constant 0 : index
    %3 = vector.load %arg4[%c0_5, %c0_6, %c0_7] : memref<15x32x8xf32, #tpu.memory_space<vmem>>, vector<1x32x8xf32>
    %4 = vector.shape_cast %3 : vector<1x32x8xf32> to vector<32x8xf32>
    %cst = arith.constant dense<0.000000e+00> : vector<16x8xf32>
    %5 = tpu.matmul %0, %4, %cst {dimension_numbers = #tpu.dot_dimension_numbers<[1], [0], [0], [1], [0, 0, 1, 1], [], []>} : vector<16x32xf32>, vector<32x8xf32>, vector<16x8xf32> -> vector<16x8xf32>
    %c0_8 = arith.constant 0 : index
    %c0_9 = arith.constant 0 : index
    %c0_10 = arith.constant 0 : index
    %6 = vector.load %arg5[%c0_8, %c0_9, %c0_10] : memref<15x1x8xf32, #tpu.memory_space<vmem>>, vector<1x1x8xf32>
    %7 = vector.shape_cast %6 : vector<1x1x8xf32> to vector<1x8xf32>
    %8 = vector.broadcast %7 : vector<1x8xf32> to vector<16x8xf32>
    %9 = arith.addf %5, %8 : vector<16x8xf32>
    %c5 = arith.constant 5 : index
    %c0_11 = arith.constant 0 : index
    %c0_12 = arith.constant 0 : index
    %10 = vector.load %arg4[%c5, %c0_11, %c0_12] : memref<15x32x8xf32, #tpu.memory_space<vmem>>, vector<1x32x8xf32>
    %11 = vector.shape_cast %10 : vector<1x32x8xf32> to vector<32x8xf32>
    %cst_13 = arith.constant dense<0.000000e+00> : vector<32x8xf32>
    %12 = tpu.matmul %1, %11, %cst_13 {dimension_numbers = #tpu.dot_dimension_numbers<[1], [0], [0], [1], [0, 0, 1, 1], [], []>} : vector<32x32xf32>, vector<32x8xf32>, vector<32x8xf32> -> vector<32x8xf32>
    %c5_14 = arith.constant 5 : index
    %c0_15 = arith.constant 0 : index
    %c0_16 = arith.constant 0 : index
    %13 = vector.load %arg5[%c5_14, %c0_15, %c0_16] : memref<15x1x8xf32, #tpu.memory_space<vmem>>, vector<1x1x8xf32>
    %14 = vector.shape_cast %13 : vector<1x1x8xf32> to vector<1x8xf32>
    %15 = vector.broadcast %14 : vector<1x8xf32> to vector<32x8xf32>
    %16 = arith.addf %12, %15 : vector<32x8xf32>
    %c10 = arith.constant 10 : index
    %c0_17 = arith.constant 0 : index
    %c0_18 = arith.constant 0 : index
    %17 = vector.load %arg4[%c10, %c0_17, %c0_18] : memref<15x32x8xf32, #tpu.memory_space<vmem>>, vector<1x32x8xf32>
    %18 = vector.shape_cast %17 : vector<1x32x8xf32> to vector<32x8xf32>
    %cst_19 = arith.constant dense<0.000000e+00> : vector<32x8xf32>
    %19 = tpu.matmul %2, %18, %cst_19 {dimension_numbers = #tpu.dot_dimension_numbers<[1], [0], [0], [1], [0, 0, 1, 1], [], []>} : vector<32x32xf32>, vector<32x8xf32>, vector<32x8xf32> -> vector<32x8xf32>
    %c10_20 = arith.constant 10 : index
    %c0_21 = arith.constant 0 : index
    %c0_22 = arith.constant 0 : index
    %20 = vector.load %arg5[%c10_20, %c0_21, %c0_22] : memref<15x1x8xf32, #tpu.memory_space<vmem>>, vector<1x1x8xf32>
    %21 = vector.shape_cast %20 : vector<1x1x8xf32> to vector<1x8xf32>
    %22 = vector.broadcast %21 : vector<1x8xf32> to vector<32x8xf32>
    %23 = arith.addf %19, %22 : vector<32x8xf32>
    %c0_23 = arith.constant 0 : index
    %c0_24 = arith.constant 0 : index
    %c0_25 = arith.constant 0 : index
    %24 = vector.load %arg6[%c0_23, %c0_24, %c0_25] : memref<5x8x32xf32, #tpu.memory_space<vmem>>, vector<1x8x32xf32>
    %25 = vector.shape_cast %24 : vector<1x8x32xf32> to vector<8x32xf32>
    %26 = vector.extract_strided_slice %9 {offsets = [0, 0], sizes = [8, 8], strides = [1, 1]} : vector<16x8xf32> to vector<8x8xf32>
    %27 = vector.extract_strided_slice %16 {offsets = [0, 0], sizes = [16, 8], strides = [1, 1]} : vector<32x8xf32> to vector<16x8xf32>
    %28 = vector.extract_strided_slice %23 {offsets = [0, 0], sizes = [16, 8], strides = [1, 1]} : vector<32x8xf32> to vector<16x8xf32>
    %cst_26 = arith.constant dense<0.000000e+00> : vector<8x16xf32>
    %29 = tpu.matmul %26, %27, %cst_26 {dimension_numbers = #tpu.dot_dimension_numbers<[1], [1], [0], [0], [0, 0, 1, 0], [], []>} : vector<8x8xf32>, vector<16x8xf32>, vector<8x16xf32> -> vector<8x16xf32>
    %cst_27 = arith.constant dense<0xFF800000> : vector<8xf32>
    %30 = vector.multi_reduction <maximumf>, %29, %cst_27 [1] : vector<8x16xf32> to vector<8xf32>
    %31 = vector.shape_cast %30 : vector<8xf32> to vector<8x1xf32>
    %32 = vector.broadcast %31 : vector<8x1xf32> to vector<8x16xf32>
    %33 = arith.subf %29, %32 : vector<8x16xf32>
    %34 = math.exp %33 : vector<8x16xf32>
    %cst_28 = arith.constant dense<0.000000e+00> : vector<8xf32>
    %35 = vector.multi_reduction <add>, %34, %cst_28 [1] : vector<8x16xf32> to vector<8xf32>
    %36 = vector.shape_cast %35 : vector<8xf32> to vector<8x1xf32>
    %37 = tpu.reciprocal %36 {approx = true} : vector<8x1xf32> -> vector<8x1xf32>
    %38 = vector.broadcast %37 : vector<8x1xf32> to vector<8x16xf32>
    %39 = arith.mulf %34, %38 : vector<8x16xf32>
    %cst_29 = arith.constant dense<0.000000e+00> : vector<8x8xf32>
    %40 = tpu.matmul %39, %28, %cst_29 {dimension_numbers = #tpu.dot_dimension_numbers<[1], [0], [0], [1], [0, 0, 1, 1], [], []>} : vector<8x16xf32>, vector<16x8xf32>, vector<8x8xf32> -> vector<8x8xf32>
    %cst_30 = arith.constant dense<0.000000e+00> : vector<8x32xf32>
    %41 = tpu.matmul %40, %25, %cst_30 {dimension_numbers = #tpu.dot_dimension_numbers<[1], [0], [0], [1], [0, 0, 1, 1], [], []>} : vector<8x8xf32>, vector<8x32xf32>, vector<8x32xf32> -> vector<8x32xf32>
    %42 = vector.extract_strided_slice %9 {offsets = [8, 0], sizes = [8, 8], strides = [1, 1]} : vector<16x8xf32> to vector<8x8xf32>
    %43 = vector.extract_strided_slice %16 {offsets = [16, 0], sizes = [16, 8], strides = [1, 1]} : vector<32x8xf32> to vector<16x8xf32>
    %44 = vector.extract_strided_slice %23 {offsets = [16, 0], sizes = [16, 8], strides = [1, 1]} : vector<32x8xf32> to vector<16x8xf32>
    %cst_31 = arith.constant dense<0.000000e+00> : vector<8x16xf32>
    %45 = tpu.matmul %42, %43, %cst_31 {dimension_numbers = #tpu.dot_dimension_numbers<[1], [1], [0], [0], [0, 0, 1, 0], [], []>} : vector<8x8xf32>, vector<16x8xf32>, vector<8x16xf32> -> vector<8x16xf32>
    %cst_32 = arith.constant dense<0xFF800000> : vector<8xf32>
    %46 = vector.multi_reduction <maximumf>, %45, %cst_32 [1] : vector<8x16xf32> to vector<8xf32>
    %47 = vector.shape_cast %46 : vector<8xf32> to vector<8x1xf32>
    %48 = vector.broadcast %47 : vector<8x1xf32> to vector<8x16xf32>
    %49 = arith.subf %45, %48 : vector<8x16xf32>
    %50 = math.exp %49 : vector<8x16xf32>
    %cst_33 = arith.constant dense<0.000000e+00> : vector<8xf32>
    %51 = vector.multi_reduction <add>, %50, %cst_33 [1] : vector<8x16xf32> to vector<8xf32>
    %52 = vector.shape_cast %51 : vector<8xf32> to vector<8x1xf32>
    %53 = tpu.reciprocal %52 {approx = true} : vector<8x1xf32> -> vector<8x1xf32>
    %54 = vector.broadcast %53 : vector<8x1xf32> to vector<8x16xf32>
    %55 = arith.mulf %50, %54 : vector<8x16xf32>
    %cst_34 = arith.constant dense<0.000000e+00> : vector<8x8xf32>
    %56 = tpu.matmul %55, %44, %cst_34 {dimension_numbers = #tpu.dot_dimension_numbers<[1], [0], [0], [1], [0, 0, 1, 1], [], []>} : vector<8x16xf32>, vector<16x8xf32>, vector<8x8xf32> -> vector<8x8xf32>
    %cst_35 = arith.constant dense<0.000000e+00> : vector<8x32xf32>
    %57 = tpu.matmul %56, %25, %cst_35 {dimension_numbers = #tpu.dot_dimension_numbers<[1], [0], [0], [1], [0, 0, 1, 1], [], []>} : vector<8x8xf32>, vector<8x32xf32>, vector<8x32xf32> -> vector<8x32xf32>
    %c1 = arith.constant 1 : index
    %c0_36 = arith.constant 0 : index
    %c0_37 = arith.constant 0 : index
    %58 = vector.load %arg4[%c1, %c0_36, %c0_37] : memref<15x32x8xf32, #tpu.memory_space<vmem>>, vector<1x32x8xf32>
    %59 = vector.shape_cast %58 : vector<1x32x8xf32> to vector<32x8xf32>
    %cst_38 = arith.constant dense<0.000000e+00> : vector<16x8xf32>
    %60 = tpu.matmul %0, %59, %cst_38 {dimension_numbers = #tpu.dot_dimension_numbers<[1], [0], [0], [1], [0, 0, 1, 1], [], []>} : vector<16x32xf32>, vector<32x8xf32>, vector<16x8xf32> -> vector<16x8xf32>
    %c1_39 = arith.constant 1 : index
    %c0_40 = arith.constant 0 : index
    %c0_41 = arith.constant 0 : index
    %61 = vector.load %arg5[%c1_39, %c0_40, %c0_41] : memref<15x1x8xf32, #tpu.memory_space<vmem>>, vector<1x1x8xf32>
    %62 = vector.shape_cast %61 : vector<1x1x8xf32> to vector<1x8xf32>
    %63 = vector.broadcast %62 : vector<1x8xf32> to vector<16x8xf32>
    %64 = arith.addf %60, %63 : vector<16x8xf32>
    %c6 = arith.constant 6 : index
    %c0_42 = arith.constant 0 : index
    %c0_43 = arith.constant 0 : index
    %65 = vector.load %arg4[%c6, %c0_42, %c0_43] : memref<15x32x8xf32, #tpu.memory_space<vmem>>, vector<1x32x8xf32>
    %66 = vector.shape_cast %65 : vector<1x32x8xf32> to vector<32x8xf32>
    %cst_44 = arith.constant dense<0.000000e+00> : vector<32x8xf32>
    %67 = tpu.matmul %1, %66, %cst_44 {dimension_numbers = #tpu.dot_dimension_numbers<[1], [0], [0], [1], [0, 0, 1, 1], [], []>} : vector<32x32xf32>, vector<32x8xf32>, vector<32x8xf32> -> vector<32x8xf32>
    %c6_45 = arith.constant 6 : index
    %c0_46 = arith.constant 0 : index
    %c0_47 = arith.constant 0 : index
    %68 = vector.load %arg5[%c6_45, %c0_46, %c0_47] : memref<15x1x8xf32, #tpu.memory_space<vmem>>, vector<1x1x8xf32>
    %69 = vector.shape_cast %68 : vector<1x1x8xf32> to vector<1x8xf32>
    %70 = vector.broadcast %69 : vector<1x8xf32> to vector<32x8xf32>
    %71 = arith.addf %67, %70 : vector<32x8xf32>
    %c11 = arith.constant 11 : index
    %c0_48 = arith.constant 0 : index
    %c0_49 = arith.constant 0 : index
    %72 = vector.load %arg4[%c11, %c0_48, %c0_49] : memref<15x32x8xf32, #tpu.memory_space<vmem>>, vector<1x32x8xf32>
    %73 = vector.shape_cast %72 : vector<1x32x8xf32> to vector<32x8xf32>
    %cst_50 = arith.constant dense<0.000000e+00> : vector<32x8xf32>
    %74 = tpu.matmul %2, %73, %cst_50 {dimension_numbers = #tpu.dot_dimension_numbers<[1], [0], [0], [1], [0, 0, 1, 1], [], []>} : vector<32x32xf32>, vector<32x8xf32>, vector<32x8xf32> -> vector<32x8xf32>
    %c11_51 = arith.constant 11 : index
    %c0_52 = arith.constant 0 : index
    %c0_53 = arith.constant 0 : index
    %75 = vector.load %arg5[%c11_51, %c0_52, %c0_53] : memref<15x1x8xf32, #tpu.memory_space<vmem>>, vector<1x1x8xf32>
    %76 = vector.shape_cast %75 : vector<1x1x8xf32> to vector<1x8xf32>
    %77 = vector.broadcast %76 : vector<1x8xf32> to vector<32x8xf32>
    %78 = arith.addf %74, %77 : vector<32x8xf32>
    %c1_54 = arith.constant 1 : index
    %c0_55 = arith.constant 0 : index
    %c0_56 = arith.constant 0 : index
    %79 = vector.load %arg6[%c1_54, %c0_55, %c0_56] : memref<5x8x32xf32, #tpu.memory_space<vmem>>, vector<1x8x32xf32>
    %80 = vector.shape_cast %79 : vector<1x8x32xf32> to vector<8x32xf32>
    %81 = vector.extract_strided_slice %64 {offsets = [0, 0], sizes = [8, 8], strides = [1, 1]} : vector<16x8xf32> to vector<8x8xf32>
    %82 = vector.extract_strided_slice %71 {offsets = [0, 0], sizes = [16, 8], strides = [1, 1]} : vector<32x8xf32> to vector<16x8xf32>
    %83 = vector.extract_strided_slice %78 {offsets = [0, 0], sizes = [16, 8], strides = [1, 1]} : vector<32x8xf32> to vector<16x8xf32>
    %cst_57 = arith.constant dense<0.000000e+00> : vector<8x16xf32>
    %84 = tpu.matmul %81, %82, %cst_57 {dimension_numbers = #tpu.dot_dimension_numbers<[1], [1], [0], [0], [0, 0, 1, 0], [], []>} : vector<8x8xf32>, vector<16x8xf32>, vector<8x16xf32> -> vector<8x16xf32>
    %cst_58 = arith.constant dense<0xFF800000> : vector<8xf32>
    %85 = vector.multi_reduction <maximumf>, %84, %cst_58 [1] : vector<8x16xf32> to vector<8xf32>
    %86 = vector.shape_cast %85 : vector<8xf32> to vector<8x1xf32>
    %87 = vector.broadcast %86 : vector<8x1xf32> to vector<8x16xf32>
    %88 = arith.subf %84, %87 : vector<8x16xf32>
    %89 = math.exp %88 : vector<8x16xf32>
    %cst_59 = arith.constant dense<0.000000e+00> : vector<8xf32>
    %90 = vector.multi_reduction <add>, %89, %cst_59 [1] : vector<8x16xf32> to vector<8xf32>
    %91 = vector.shape_cast %90 : vector<8xf32> to vector<8x1xf32>
    %92 = tpu.reciprocal %91 {approx = true} : vector<8x1xf32> -> vector<8x1xf32>
    %93 = vector.broadcast %92 : vector<8x1xf32> to vector<8x16xf32>
    %94 = arith.mulf %89, %93 : vector<8x16xf32>
    %cst_60 = arith.constant dense<0.000000e+00> : vector<8x8xf32>
    %95 = tpu.matmul %94, %83, %cst_60 {dimension_numbers = #tpu.dot_dimension_numbers<[1], [0], [0], [1], [0, 0, 1, 1], [], []>} : vector<8x16xf32>, vector<16x8xf32>, vector<8x8xf32> -> vector<8x8xf32>
    %cst_61 = arith.constant dense<0.000000e+00> : vector<8x32xf32>
    %96 = tpu.matmul %95, %80, %cst_61 {dimension_numbers = #tpu.dot_dimension_numbers<[1], [0], [0], [1], [0, 0, 1, 1], [], []>} : vector<8x8xf32>, vector<8x32xf32>, vector<8x32xf32> -> vector<8x32xf32>
    %97 = arith.addf %41, %96 : vector<8x32xf32>
    %98 = vector.extract_strided_slice %64 {offsets = [8, 0], sizes = [8, 8], strides = [1, 1]} : vector<16x8xf32> to vector<8x8xf32>
    %99 = vector.extract_strided_slice %71 {offsets = [16, 0], sizes = [16, 8], strides = [1, 1]} : vector<32x8xf32> to vector<16x8xf32>
    %100 = vector.extract_strided_slice %78 {offsets = [16, 0], sizes = [16, 8], strides = [1, 1]} : vector<32x8xf32> to vector<16x8xf32>
    %cst_62 = arith.constant dense<0.000000e+00> : vector<8x16xf32>
    %101 = tpu.matmul %98, %99, %cst_62 {dimension_numbers = #tpu.dot_dimension_numbers<[1], [1], [0], [0], [0, 0, 1, 0], [], []>} : vector<8x8xf32>, vector<16x8xf32>, vector<8x16xf32> -> vector<8x16xf32>
    %cst_63 = arith.constant dense<0xFF800000> : vector<8xf32>
    %102 = vector.multi_reduction <maximumf>, %101, %cst_63 [1] : vector<8x16xf32> to vector<8xf32>
    %103 = vector.shape_cast %102 : vector<8xf32> to vector<8x1xf32>
    %104 = vector.broadcast %103 : vector<8x1xf32> to vector<8x16xf32>
    %105 = arith.subf %101, %104 : vector<8x16xf32>
    %106 = math.exp %105 : vector<8x16xf32>
    %cst_64 = arith.constant dense<0.000000e+00> : vector<8xf32>
    %107 = vector.multi_reduction <add>, %106, %cst_64 [1] : vector<8x16xf32> to vector<8xf32>
    %108 = vector.shape_cast %107 : vector<8xf32> to vector<8x1xf32>
    %109 = tpu.reciprocal %108 {approx = true} : vector<8x1xf32> -> vector<8x1xf32>
    %110 = vector.broadcast %109 : vector<8x1xf32> to vector<8x16xf32>
    %111 = arith.mulf %106, %110 : vector<8x16xf32>
    %cst_65 = arith.constant dense<0.000000e+00> : vector<8x8xf32>
    %112 = tpu.matmul %111, %100, %cst_65 {dimension_numbers = #tpu.dot_dimension_numbers<[1], [0], [0], [1], [0, 0, 1, 1], [], []>} : vector<8x16xf32>, vector<16x8xf32>, vector<8x8xf32> -> vector<8x8xf32>
    %cst_66 = arith.constant dense<0.000000e+00> : vector<8x32xf32>
    %113 = tpu.matmul %112, %80, %cst_66 {dimension_numbers = #tpu.dot_dimension_numbers<[1], [0], [0], [1], [0, 0, 1, 1], [], []>} : vector<8x8xf32>, vector<8x32xf32>, vector<8x32xf32> -> vector<8x32xf32>
    %114 = arith.addf %57, %113 : vector<8x32xf32>
    %c2 = arith.constant 2 : index
    %c0_67 = arith.constant 0 : index
    %c0_68 = arith.constant 0 : index
    %115 = vector.load %arg4[%c2, %c0_67, %c0_68] : memref<15x32x8xf32, #tpu.memory_space<vmem>>, vector<1x32x8xf32>
    %116 = vector.shape_cast %115 : vector<1x32x8xf32> to vector<32x8xf32>
    %cst_69 = arith.constant dense<0.000000e+00> : vector<16x8xf32>
    %117 = tpu.matmul %0, %116, %cst_69 {dimension_numbers = #tpu.dot_dimension_numbers<[1], [0], [0], [1], [0, 0, 1, 1], [], []>} : vector<16x32xf32>, vector<32x8xf32>, vector<16x8xf32> -> vector<16x8xf32>
    %c2_70 = arith.constant 2 : index
    %c0_71 = arith.constant 0 : index
    %c0_72 = arith.constant 0 : index
    %118 = vector.load %arg5[%c2_70, %c0_71, %c0_72] : memref<15x1x8xf32, #tpu.memory_space<vmem>>, vector<1x1x8xf32>
    %119 = vector.shape_cast %118 : vector<1x1x8xf32> to vector<1x8xf32>
    %120 = vector.broadcast %119 : vector<1x8xf32> to vector<16x8xf32>
    %121 = arith.addf %117, %120 : vector<16x8xf32>
    %c7 = arith.constant 7 : index
    %c0_73 = arith.constant 0 : index
    %c0_74 = arith.constant 0 : index
    %122 = vector.load %arg4[%c7, %c0_73, %c0_74] : memref<15x32x8xf32, #tpu.memory_space<vmem>>, vector<1x32x8xf32>
    %123 = vector.shape_cast %122 : vector<1x32x8xf32> to vector<32x8xf32>
    %cst_75 = arith.constant dense<0.000000e+00> : vector<32x8xf32>
    %124 = tpu.matmul %1, %123, %cst_75 {dimension_numbers = #tpu.dot_dimension_numbers<[1], [0], [0], [1], [0, 0, 1, 1], [], []>} : vector<32x32xf32>, vector<32x8xf32>, vector<32x8xf32> -> vector<32x8xf32>
    %c7_76 = arith.constant 7 : index
    %c0_77 = arith.constant 0 : index
    %c0_78 = arith.constant 0 : index
    %125 = vector.load %arg5[%c7_76, %c0_77, %c0_78] : memref<15x1x8xf32, #tpu.memory_space<vmem>>, vector<1x1x8xf32>
    %126 = vector.shape_cast %125 : vector<1x1x8xf32> to vector<1x8xf32>
    %127 = vector.broadcast %126 : vector<1x8xf32> to vector<32x8xf32>
    %128 = arith.addf %124, %127 : vector<32x8xf32>
    %c12 = arith.constant 12 : index
    %c0_79 = arith.constant 0 : index
    %c0_80 = arith.constant 0 : index
    %129 = vector.load %arg4[%c12, %c0_79, %c0_80] : memref<15x32x8xf32, #tpu.memory_space<vmem>>, vector<1x32x8xf32>
    %130 = vector.shape_cast %129 : vector<1x32x8xf32> to vector<32x8xf32>
    %cst_81 = arith.constant dense<0.000000e+00> : vector<32x8xf32>
    %131 = tpu.matmul %2, %130, %cst_81 {dimension_numbers = #tpu.dot_dimension_numbers<[1], [0], [0], [1], [0, 0, 1, 1], [], []>} : vector<32x32xf32>, vector<32x8xf32>, vector<32x8xf32> -> vector<32x8xf32>
    %c12_82 = arith.constant 12 : index
    %c0_83 = arith.constant 0 : index
    %c0_84 = arith.constant 0 : index
    %132 = vector.load %arg5[%c12_82, %c0_83, %c0_84] : memref<15x1x8xf32, #tpu.memory_space<vmem>>, vector<1x1x8xf32>
    %133 = vector.shape_cast %132 : vector<1x1x8xf32> to vector<1x8xf32>
    %134 = vector.broadcast %133 : vector<1x8xf32> to vector<32x8xf32>
    %135 = arith.addf %131, %134 : vector<32x8xf32>
    %c2_85 = arith.constant 2 : index
    %c0_86 = arith.constant 0 : index
    %c0_87 = arith.constant 0 : index
    %136 = vector.load %arg6[%c2_85, %c0_86, %c0_87] : memref<5x8x32xf32, #tpu.memory_space<vmem>>, vector<1x8x32xf32>
    %137 = vector.shape_cast %136 : vector<1x8x32xf32> to vector<8x32xf32>
    %138 = vector.extract_strided_slice %121 {offsets = [0, 0], sizes = [8, 8], strides = [1, 1]} : vector<16x8xf32> to vector<8x8xf32>
    %139 = vector.extract_strided_slice %128 {offsets = [0, 0], sizes = [16, 8], strides = [1, 1]} : vector<32x8xf32> to vector<16x8xf32>
    %140 = vector.extract_strided_slice %135 {offsets = [0, 0], sizes = [16, 8], strides = [1, 1]} : vector<32x8xf32> to vector<16x8xf32>
    %cst_88 = arith.constant dense<0.000000e+00> : vector<8x16xf32>
    %141 = tpu.matmul %138, %139, %cst_88 {dimension_numbers = #tpu.dot_dimension_numbers<[1], [1], [0], [0], [0, 0, 1, 0], [], []>} : vector<8x8xf32>, vector<16x8xf32>, vector<8x16xf32> -> vector<8x16xf32>
    %cst_89 = arith.constant dense<0xFF800000> : vector<8xf32>
    %142 = vector.multi_reduction <maximumf>, %141, %cst_89 [1] : vector<8x16xf32> to vector<8xf32>
    %143 = vector.shape_cast %142 : vector<8xf32> to vector<8x1xf32>
    %144 = vector.broadcast %143 : vector<8x1xf32> to vector<8x16xf32>
    %145 = arith.subf %141, %144 : vector<8x16xf32>
    %146 = math.exp %145 : vector<8x16xf32>
    %cst_90 = arith.constant dense<0.000000e+00> : vector<8xf32>
    %147 = vector.multi_reduction <add>, %146, %cst_90 [1] : vector<8x16xf32> to vector<8xf32>
    %148 = vector.shape_cast %147 : vector<8xf32> to vector<8x1xf32>
    %149 = tpu.reciprocal %148 {approx = true} : vector<8x1xf32> -> vector<8x1xf32>
    %150 = vector.broadcast %149 : vector<8x1xf32> to vector<8x16xf32>
    %151 = arith.mulf %146, %150 : vector<8x16xf32>
    %cst_91 = arith.constant dense<0.000000e+00> : vector<8x8xf32>
    %152 = tpu.matmul %151, %140, %cst_91 {dimension_numbers = #tpu.dot_dimension_numbers<[1], [0], [0], [1], [0, 0, 1, 1], [], []>} : vector<8x16xf32>, vector<16x8xf32>, vector<8x8xf32> -> vector<8x8xf32>
    %cst_92 = arith.constant dense<0.000000e+00> : vector<8x32xf32>
    %153 = tpu.matmul %152, %137, %cst_92 {dimension_numbers = #tpu.dot_dimension_numbers<[1], [0], [0], [1], [0, 0, 1, 1], [], []>} : vector<8x8xf32>, vector<8x32xf32>, vector<8x32xf32> -> vector<8x32xf32>
    %154 = arith.addf %97, %153 : vector<8x32xf32>
    %155 = vector.extract_strided_slice %121 {offsets = [8, 0], sizes = [8, 8], strides = [1, 1]} : vector<16x8xf32> to vector<8x8xf32>
    %156 = vector.extract_strided_slice %128 {offsets = [16, 0], sizes = [16, 8], strides = [1, 1]} : vector<32x8xf32> to vector<16x8xf32>
    %157 = vector.extract_strided_slice %135 {offsets = [16, 0], sizes = [16, 8], strides = [1, 1]} : vector<32x8xf32> to vector<16x8xf32>
    %cst_93 = arith.constant dense<0.000000e+00> : vector<8x16xf32>
    %158 = tpu.matmul %155, %156, %cst_93 {dimension_numbers = #tpu.dot_dimension_numbers<[1], [1], [0], [0], [0, 0, 1, 0], [], []>} : vector<8x8xf32>, vector<16x8xf32>, vector<8x16xf32> -> vector<8x16xf32>
    %cst_94 = arith.constant dense<0xFF800000> : vector<8xf32>
    %159 = vector.multi_reduction <maximumf>, %158, %cst_94 [1] : vector<8x16xf32> to vector<8xf32>
    %160 = vector.shape_cast %159 : vector<8xf32> to vector<8x1xf32>
    %161 = vector.broadcast %160 : vector<8x1xf32> to vector<8x16xf32>
    %162 = arith.subf %158, %161 : vector<8x16xf32>
    %163 = math.exp %162 : vector<8x16xf32>
    %cst_95 = arith.constant dense<0.000000e+00> : vector<8xf32>
    %164 = vector.multi_reduction <add>, %163, %cst_95 [1] : vector<8x16xf32> to vector<8xf32>
    %165 = vector.shape_cast %164 : vector<8xf32> to vector<8x1xf32>
    %166 = tpu.reciprocal %165 {approx = true} : vector<8x1xf32> -> vector<8x1xf32>
    %167 = vector.broadcast %166 : vector<8x1xf32> to vector<8x16xf32>
    %168 = arith.mulf %163, %167 : vector<8x16xf32>
    %cst_96 = arith.constant dense<0.000000e+00> : vector<8x8xf32>
    %169 = tpu.matmul %168, %157, %cst_96 {dimension_numbers = #tpu.dot_dimension_numbers<[1], [0], [0], [1], [0, 0, 1, 1], [], []>} : vector<8x16xf32>, vector<16x8xf32>, vector<8x8xf32> -> vector<8x8xf32>
    %cst_97 = arith.constant dense<0.000000e+00> : vector<8x32xf32>
    %170 = tpu.matmul %169, %137, %cst_97 {dimension_numbers = #tpu.dot_dimension_numbers<[1], [0], [0], [1], [0, 0, 1, 1], [], []>} : vector<8x8xf32>, vector<8x32xf32>, vector<8x32xf32> -> vector<8x32xf32>
    %171 = arith.addf %114, %170 : vector<8x32xf32>
    %c3 = arith.constant 3 : index
    %c0_98 = arith.constant 0 : index
    %c0_99 = arith.constant 0 : index
    %172 = vector.load %arg4[%c3, %c0_98, %c0_99] : memref<15x32x8xf32, #tpu.memory_space<vmem>>, vector<1x32x8xf32>
    %173 = vector.shape_cast %172 : vector<1x32x8xf32> to vector<32x8xf32>
    %cst_100 = arith.constant dense<0.000000e+00> : vector<16x8xf32>
    %174 = tpu.matmul %0, %173, %cst_100 {dimension_numbers = #tpu.dot_dimension_numbers<[1], [0], [0], [1], [0, 0, 1, 1], [], []>} : vector<16x32xf32>, vector<32x8xf32>, vector<16x8xf32> -> vector<16x8xf32>
    %c3_101 = arith.constant 3 : index
    %c0_102 = arith.constant 0 : index
    %c0_103 = arith.constant 0 : index
    %175 = vector.load %arg5[%c3_101, %c0_102, %c0_103] : memref<15x1x8xf32, #tpu.memory_space<vmem>>, vector<1x1x8xf32>
    %176 = vector.shape_cast %175 : vector<1x1x8xf32> to vector<1x8xf32>
    %177 = vector.broadcast %176 : vector<1x8xf32> to vector<16x8xf32>
    %178 = arith.addf %174, %177 : vector<16x8xf32>
    %c8 = arith.constant 8 : index
    %c0_104 = arith.constant 0 : index
    %c0_105 = arith.constant 0 : index
    %179 = vector.load %arg4[%c8, %c0_104, %c0_105] : memref<15x32x8xf32, #tpu.memory_space<vmem>>, vector<1x32x8xf32>
    %180 = vector.shape_cast %179 : vector<1x32x8xf32> to vector<32x8xf32>
    %cst_106 = arith.constant dense<0.000000e+00> : vector<32x8xf32>
    %181 = tpu.matmul %1, %180, %cst_106 {dimension_numbers = #tpu.dot_dimension_numbers<[1], [0], [0], [1], [0, 0, 1, 1], [], []>} : vector<32x32xf32>, vector<32x8xf32>, vector<32x8xf32> -> vector<32x8xf32>
    %c8_107 = arith.constant 8 : index
    %c0_108 = arith.constant 0 : index
    %c0_109 = arith.constant 0 : index
    %182 = vector.load %arg5[%c8_107, %c0_108, %c0_109] : memref<15x1x8xf32, #tpu.memory_space<vmem>>, vector<1x1x8xf32>
    %183 = vector.shape_cast %182 : vector<1x1x8xf32> to vector<1x8xf32>
    %184 = vector.broadcast %183 : vector<1x8xf32> to vector<32x8xf32>
    %185 = arith.addf %181, %184 : vector<32x8xf32>
    %c13 = arith.constant 13 : index
    %c0_110 = arith.constant 0 : index
    %c0_111 = arith.constant 0 : index
    %186 = vector.load %arg4[%c13, %c0_110, %c0_111] : memref<15x32x8xf32, #tpu.memory_space<vmem>>, vector<1x32x8xf32>
    %187 = vector.shape_cast %186 : vector<1x32x8xf32> to vector<32x8xf32>
    %cst_112 = arith.constant dense<0.000000e+00> : vector<32x8xf32>
    %188 = tpu.matmul %2, %187, %cst_112 {dimension_numbers = #tpu.dot_dimension_numbers<[1], [0], [0], [1], [0, 0, 1, 1], [], []>} : vector<32x32xf32>, vector<32x8xf32>, vector<32x8xf32> -> vector<32x8xf32>
    %c13_113 = arith.constant 13 : index
    %c0_114 = arith.constant 0 : index
    %c0_115 = arith.constant 0 : index
    %189 = vector.load %arg5[%c13_113, %c0_114, %c0_115] : memref<15x1x8xf32, #tpu.memory_space<vmem>>, vector<1x1x8xf32>
    %190 = vector.shape_cast %189 : vector<1x1x8xf32> to vector<1x8xf32>
    %191 = vector.broadcast %190 : vector<1x8xf32> to vector<32x8xf32>
    %192 = arith.addf %188, %191 : vector<32x8xf32>
    %c3_116 = arith.constant 3 : index
    %c0_117 = arith.constant 0 : index
    %c0_118 = arith.constant 0 : index
    %193 = vector.load %arg6[%c3_116, %c0_117, %c0_118] : memref<5x8x32xf32, #tpu.memory_space<vmem>>, vector<1x8x32xf32>
    %194 = vector.shape_cast %193 : vector<1x8x32xf32> to vector<8x32xf32>
    %195 = vector.extract_strided_slice %178 {offsets = [0, 0], sizes = [8, 8], strides = [1, 1]} : vector<16x8xf32> to vector<8x8xf32>
    %196 = vector.extract_strided_slice %185 {offsets = [0, 0], sizes = [16, 8], strides = [1, 1]} : vector<32x8xf32> to vector<16x8xf32>
    %197 = vector.extract_strided_slice %192 {offsets = [0, 0], sizes = [16, 8], strides = [1, 1]} : vector<32x8xf32> to vector<16x8xf32>
    %cst_119 = arith.constant dense<0.000000e+00> : vector<8x16xf32>
    %198 = tpu.matmul %195, %196, %cst_119 {dimension_numbers = #tpu.dot_dimension_numbers<[1], [1], [0], [0], [0, 0, 1, 0], [], []>} : vector<8x8xf32>, vector<16x8xf32>, vector<8x16xf32> -> vector<8x16xf32>
    %cst_120 = arith.constant dense<0xFF800000> : vector<8xf32>
    %199 = vector.multi_reduction <maximumf>, %198, %cst_120 [1] : vector<8x16xf32> to vector<8xf32>
    %200 = vector.shape_cast %199 : vector<8xf32> to vector<8x1xf32>
    %201 = vector.broadcast %200 : vector<8x1xf32> to vector<8x16xf32>
    %202 = arith.subf %198, %201 : vector<8x16xf32>
    %203 = math.exp %202 : vector<8x16xf32>
    %cst_121 = arith.constant dense<0.000000e+00> : vector<8xf32>
    %204 = vector.multi_reduction <add>, %203, %cst_121 [1] : vector<8x16xf32> to vector<8xf32>
    %205 = vector.shape_cast %204 : vector<8xf32> to vector<8x1xf32>
    %206 = tpu.reciprocal %205 {approx = true} : vector<8x1xf32> -> vector<8x1xf32>
    %207 = vector.broadcast %206 : vector<8x1xf32> to vector<8x16xf32>
    %208 = arith.mulf %203, %207 : vector<8x16xf32>
    %cst_122 = arith.constant dense<0.000000e+00> : vector<8x8xf32>
    %209 = tpu.matmul %208, %197, %cst_122 {dimension_numbers = #tpu.dot_dimension_numbers<[1], [0], [0], [1], [0, 0, 1, 1], [], []>} : vector<8x16xf32>, vector<16x8xf32>, vector<8x8xf32> -> vector<8x8xf32>
    %cst_123 = arith.constant dense<0.000000e+00> : vector<8x32xf32>
    %210 = tpu.matmul %209, %194, %cst_123 {dimension_numbers = #tpu.dot_dimension_numbers<[1], [0], [0], [1], [0, 0, 1, 1], [], []>} : vector<8x8xf32>, vector<8x32xf32>, vector<8x32xf32> -> vector<8x32xf32>
    %211 = arith.addf %154, %210 : vector<8x32xf32>
    %212 = vector.extract_strided_slice %178 {offsets = [8, 0], sizes = [8, 8], strides = [1, 1]} : vector<16x8xf32> to vector<8x8xf32>
    %213 = vector.extract_strided_slice %185 {offsets = [16, 0], sizes = [16, 8], strides = [1, 1]} : vector<32x8xf32> to vector<16x8xf32>
    %214 = vector.extract_strided_slice %192 {offsets = [16, 0], sizes = [16, 8], strides = [1, 1]} : vector<32x8xf32> to vector<16x8xf32>
    %cst_124 = arith.constant dense<0.000000e+00> : vector<8x16xf32>
    %215 = tpu.matmul %212, %213, %cst_124 {dimension_numbers = #tpu.dot_dimension_numbers<[1], [1], [0], [0], [0, 0, 1, 0], [], []>} : vector<8x8xf32>, vector<16x8xf32>, vector<8x16xf32> -> vector<8x16xf32>
    %cst_125 = arith.constant dense<0xFF800000> : vector<8xf32>
    %216 = vector.multi_reduction <maximumf>, %215, %cst_125 [1] : vector<8x16xf32> to vector<8xf32>
    %217 = vector.shape_cast %216 : vector<8xf32> to vector<8x1xf32>
    %218 = vector.broadcast %217 : vector<8x1xf32> to vector<8x16xf32>
    %219 = arith.subf %215, %218 : vector<8x16xf32>
    %220 = math.exp %219 : vector<8x16xf32>
    %cst_126 = arith.constant dense<0.000000e+00> : vector<8xf32>
    %221 = vector.multi_reduction <add>, %220, %cst_126 [1] : vector<8x16xf32> to vector<8xf32>
    %222 = vector.shape_cast %221 : vector<8xf32> to vector<8x1xf32>
    %223 = tpu.reciprocal %222 {approx = true} : vector<8x1xf32> -> vector<8x1xf32>
    %224 = vector.broadcast %223 : vector<8x1xf32> to vector<8x16xf32>
    %225 = arith.mulf %220, %224 : vector<8x16xf32>
    %cst_127 = arith.constant dense<0.000000e+00> : vector<8x8xf32>
    %226 = tpu.matmul %225, %214, %cst_127 {dimension_numbers = #tpu.dot_dimension_numbers<[1], [0], [0], [1], [0, 0, 1, 1], [], []>} : vector<8x16xf32>, vector<16x8xf32>, vector<8x8xf32> -> vector<8x8xf32>
    %cst_128 = arith.constant dense<0.000000e+00> : vector<8x32xf32>
    %227 = tpu.matmul %226, %194, %cst_128 {dimension_numbers = #tpu.dot_dimension_numbers<[1], [0], [0], [1], [0, 0, 1, 1], [], []>} : vector<8x8xf32>, vector<8x32xf32>, vector<8x32xf32> -> vector<8x32xf32>
    %228 = arith.addf %171, %227 : vector<8x32xf32>
    %c4 = arith.constant 4 : index
    %c0_129 = arith.constant 0 : index
    %c0_130 = arith.constant 0 : index
    %229 = vector.load %arg4[%c4, %c0_129, %c0_130] : memref<15x32x8xf32, #tpu.memory_space<vmem>>, vector<1x32x8xf32>
    %230 = vector.shape_cast %229 : vector<1x32x8xf32> to vector<32x8xf32>
    %cst_131 = arith.constant dense<0.000000e+00> : vector<16x8xf32>
    %231 = tpu.matmul %0, %230, %cst_131 {dimension_numbers = #tpu.dot_dimension_numbers<[1], [0], [0], [1], [0, 0, 1, 1], [], []>} : vector<16x32xf32>, vector<32x8xf32>, vector<16x8xf32> -> vector<16x8xf32>
    %c4_132 = arith.constant 4 : index
    %c0_133 = arith.constant 0 : index
    %c0_134 = arith.constant 0 : index
    %232 = vector.load %arg5[%c4_132, %c0_133, %c0_134] : memref<15x1x8xf32, #tpu.memory_space<vmem>>, vector<1x1x8xf32>
    %233 = vector.shape_cast %232 : vector<1x1x8xf32> to vector<1x8xf32>
    %234 = vector.broadcast %233 : vector<1x8xf32> to vector<16x8xf32>
    %235 = arith.addf %231, %234 : vector<16x8xf32>
    %c9 = arith.constant 9 : index
    %c0_135 = arith.constant 0 : index
    %c0_136 = arith.constant 0 : index
    %236 = vector.load %arg4[%c9, %c0_135, %c0_136] : memref<15x32x8xf32, #tpu.memory_space<vmem>>, vector<1x32x8xf32>
    %237 = vector.shape_cast %236 : vector<1x32x8xf32> to vector<32x8xf32>
    %cst_137 = arith.constant dense<0.000000e+00> : vector<32x8xf32>
    %238 = tpu.matmul %1, %237, %cst_137 {dimension_numbers = #tpu.dot_dimension_numbers<[1], [0], [0], [1], [0, 0, 1, 1], [], []>} : vector<32x32xf32>, vector<32x8xf32>, vector<32x8xf32> -> vector<32x8xf32>
    %c9_138 = arith.constant 9 : index
    %c0_139 = arith.constant 0 : index
    %c0_140 = arith.constant 0 : index
    %239 = vector.load %arg5[%c9_138, %c0_139, %c0_140] : memref<15x1x8xf32, #tpu.memory_space<vmem>>, vector<1x1x8xf32>
    %240 = vector.shape_cast %239 : vector<1x1x8xf32> to vector<1x8xf32>
    %241 = vector.broadcast %240 : vector<1x8xf32> to vector<32x8xf32>
    %242 = arith.addf %238, %241 : vector<32x8xf32>
    %c14 = arith.constant 14 : index
    %c0_141 = arith.constant 0 : index
    %c0_142 = arith.constant 0 : index
    %243 = vector.load %arg4[%c14, %c0_141, %c0_142] : memref<15x32x8xf32, #tpu.memory_space<vmem>>, vector<1x32x8xf32>
    %244 = vector.shape_cast %243 : vector<1x32x8xf32> to vector<32x8xf32>
    %cst_143 = arith.constant dense<0.000000e+00> : vector<32x8xf32>
    %245 = tpu.matmul %2, %244, %cst_143 {dimension_numbers = #tpu.dot_dimension_numbers<[1], [0], [0], [1], [0, 0, 1, 1], [], []>} : vector<32x32xf32>, vector<32x8xf32>, vector<32x8xf32> -> vector<32x8xf32>
    %c14_144 = arith.constant 14 : index
    %c0_145 = arith.constant 0 : index
    %c0_146 = arith.constant 0 : index
    %246 = vector.load %arg5[%c14_144, %c0_145, %c0_146] : memref<15x1x8xf32, #tpu.memory_space<vmem>>, vector<1x1x8xf32>
    %247 = vector.shape_cast %246 : vector<1x1x8xf32> to vector<1x8xf32>
    %248 = vector.broadcast %247 : vector<1x8xf32> to vector<32x8xf32>
    %249 = arith.addf %245, %248 : vector<32x8xf32>
    %c4_147 = arith.constant 4 : index
    %c0_148 = arith.constant 0 : index
    %c0_149 = arith.constant 0 : index
    %250 = vector.load %arg6[%c4_147, %c0_148, %c0_149] : memref<5x8x32xf32, #tpu.memory_space<vmem>>, vector<1x8x32xf32>
    %251 = vector.shape_cast %250 : vector<1x8x32xf32> to vector<8x32xf32>
    %252 = vector.extract_strided_slice %235 {offsets = [0, 0], sizes = [8, 8], strides = [1, 1]} : vector<16x8xf32> to vector<8x8xf32>
    %253 = vector.extract_strided_slice %242 {offsets = [0, 0], sizes = [16, 8], strides = [1, 1]} : vector<32x8xf32> to vector<16x8xf32>
    %254 = vector.extract_strided_slice %249 {offsets = [0, 0], sizes = [16, 8], strides = [1, 1]} : vector<32x8xf32> to vector<16x8xf32>
    %cst_150 = arith.constant dense<0.000000e+00> : vector<8x16xf32>
    %255 = tpu.matmul %252, %253, %cst_150 {dimension_numbers = #tpu.dot_dimension_numbers<[1], [1], [0], [0], [0, 0, 1, 0], [], []>} : vector<8x8xf32>, vector<16x8xf32>, vector<8x16xf32> -> vector<8x16xf32>
    %cst_151 = arith.constant dense<0xFF800000> : vector<8xf32>
    %256 = vector.multi_reduction <maximumf>, %255, %cst_151 [1] : vector<8x16xf32> to vector<8xf32>
    %257 = vector.shape_cast %256 : vector<8xf32> to vector<8x1xf32>
    %258 = vector.broadcast %257 : vector<8x1xf32> to vector<8x16xf32>
    %259 = arith.subf %255, %258 : vector<8x16xf32>
    %260 = math.exp %259 : vector<8x16xf32>
    %cst_152 = arith.constant dense<0.000000e+00> : vector<8xf32>
    %261 = vector.multi_reduction <add>, %260, %cst_152 [1] : vector<8x16xf32> to vector<8xf32>
    %262 = vector.shape_cast %261 : vector<8xf32> to vector<8x1xf32>
    %263 = tpu.reciprocal %262 {approx = true} : vector<8x1xf32> -> vector<8x1xf32>
    %264 = vector.broadcast %263 : vector<8x1xf32> to vector<8x16xf32>
    %265 = arith.mulf %260, %264 : vector<8x16xf32>
    %cst_153 = arith.constant dense<0.000000e+00> : vector<8x8xf32>
    %266 = tpu.matmul %265, %254, %cst_153 {dimension_numbers = #tpu.dot_dimension_numbers<[1], [0], [0], [1], [0, 0, 1, 1], [], []>} : vector<8x16xf32>, vector<16x8xf32>, vector<8x8xf32> -> vector<8x8xf32>
    %cst_154 = arith.constant dense<0.000000e+00> : vector<8x32xf32>
    %267 = tpu.matmul %266, %251, %cst_154 {dimension_numbers = #tpu.dot_dimension_numbers<[1], [0], [0], [1], [0, 0, 1, 1], [], []>} : vector<8x8xf32>, vector<8x32xf32>, vector<8x32xf32> -> vector<8x32xf32>
    %268 = arith.addf %211, %267 : vector<8x32xf32>
    %269 = vector.extract_strided_slice %235 {offsets = [8, 0], sizes = [8, 8], strides = [1, 1]} : vector<16x8xf32> to vector<8x8xf32>
    %270 = vector.extract_strided_slice %242 {offsets = [16, 0], sizes = [16, 8], strides = [1, 1]} : vector<32x8xf32> to vector<16x8xf32>
    %271 = vector.extract_strided_slice %249 {offsets = [16, 0], sizes = [16, 8], strides = [1, 1]} : vector<32x8xf32> to vector<16x8xf32>
    %cst_155 = arith.constant dense<0.000000e+00> : vector<8x16xf32>
    %272 = tpu.matmul %269, %270, %cst_155 {dimension_numbers = #tpu.dot_dimension_numbers<[1], [1], [0], [0], [0, 0, 1, 0], [], []>} : vector<8x8xf32>, vector<16x8xf32>, vector<8x16xf32> -> vector<8x16xf32>
    %cst_156 = arith.constant dense<0xFF800000> : vector<8xf32>
    %273 = vector.multi_reduction <maximumf>, %272, %cst_156 [1] : vector<8x16xf32> to vector<8xf32>
    %274 = vector.shape_cast %273 : vector<8xf32> to vector<8x1xf32>
    %275 = vector.broadcast %274 : vector<8x1xf32> to vector<8x16xf32>
    %276 = arith.subf %272, %275 : vector<8x16xf32>
    %277 = math.exp %276 : vector<8x16xf32>
    %cst_157 = arith.constant dense<0.000000e+00> : vector<8xf32>
    %278 = vector.multi_reduction <add>, %277, %cst_157 [1] : vector<8x16xf32> to vector<8xf32>
    %279 = vector.shape_cast %278 : vector<8xf32> to vector<8x1xf32>
    %280 = tpu.reciprocal %279 {approx = true} : vector<8x1xf32> -> vector<8x1xf32>
    %281 = vector.broadcast %280 : vector<8x1xf32> to vector<8x16xf32>
    %282 = arith.mulf %277, %281 : vector<8x16xf32>
    %cst_158 = arith.constant dense<0.000000e+00> : vector<8x8xf32>
    %283 = tpu.matmul %282, %271, %cst_158 {dimension_numbers = #tpu.dot_dimension_numbers<[1], [0], [0], [1], [0, 0, 1, 1], [], []>} : vector<8x16xf32>, vector<16x8xf32>, vector<8x8xf32> -> vector<8x8xf32>
    %cst_159 = arith.constant dense<0.000000e+00> : vector<8x32xf32>
    %284 = tpu.matmul %283, %251, %cst_159 {dimension_numbers = #tpu.dot_dimension_numbers<[1], [0], [0], [1], [0, 0, 1, 1], [], []>} : vector<8x8xf32>, vector<8x32xf32>, vector<8x32xf32> -> vector<8x32xf32>
    %285 = arith.addf %228, %284 : vector<8x32xf32>
    %c0_160 = arith.constant 0 : index
    %c0_161 = arith.constant 0 : index
    %286 = vector.load %arg7[%c0_160, %c0_161] : memref<1x32xf32, #tpu.memory_space<vmem>>, vector<1x32xf32>
    %287 = vector.broadcast %286 : vector<1x32xf32> to vector<8x32xf32>
    %288 = arith.addf %268, %287 : vector<8x32xf32>
    %c0_162 = arith.constant 0 : index
    %c0_163 = arith.constant 0 : index
    %289 = vector.load %arg8[%c0_162, %c0_163] : memref<16x32xf32, #tpu.memory_space<vmem>>, vector<8x32xf32>
    tpu.vector_store %arg8[%c0_162, %c0_163], %288 {strides = array<i32>} : memref<16x32xf32, #tpu.memory_space<vmem>>, vector<8x32xf32>,
    %290 = vector.broadcast %286 : vector<1x32xf32> to vector<8x32xf32>
    %291 = arith.addf %285, %290 : vector<8x32xf32>
    %c8_164 = arith.constant 8 : index
    %c0_165 = arith.constant 0 : index
    %292 = vector.load %arg8[%c8_164, %c0_165] : memref<16x32xf32, #tpu.memory_space<vmem>>, vector<8x32xf32>
    tpu.vector_store %arg8[%c8_164, %c0_165], %291 {strides = array<i32>} : memref<16x32xf32, #tpu.memory_space<vmem>>, vector<8x32xf32>,
    return
  }
  func.func @transform_0(%arg0: i32) -> (i32, i32) {
    %c0_i32 = arith.constant 0 : i32
    %c0_i32_0 = arith.constant 0 : i32
    %c0_i32_1 = arith.constant 0 : i32
    return %c0_i32, %c0_i32_0 : i32, i32
  }
  func.func @transform_1(%arg0: i32) -> (i32, i32) {
    %c0_i32 = arith.constant 0 : i32
    %c0_i32_0 = arith.constant 0 : i32
    %c0_i32_1 = arith.constant 0 : i32
    return %c0_i32, %c0_i32_0 : i32, i32
  }
  func.func @transform_2(%arg0: i32) -> (i32, i32) {
    %c0_i32 = arith.constant 0 : i32
    %c0_i32_0 = arith.constant 0 : i32
    %c0_i32_1 = arith.constant 0 : i32
    return %c0_i32, %c0_i32_0 : i32, i32
  }
  func.func @transform_3(%arg0: i32) -> (i32, i32, i32) {
    %c0_i32 = arith.constant 0 : i32
    %c0_i32_0 = arith.constant 0 : i32
    %c0_i32_1 = arith.constant 0 : i32
    %c0_i32_2 = arith.constant 0 : i32
    return %c0_i32, %c0_i32_0, %c0_i32_1 : i32, i32, i32
  }
  func.func @transform_4(%arg0: i32) -> (i32, i32, i32) {
    %c0_i32 = arith.constant 0 : i32
    %c0_i32_0 = arith.constant 0 : i32
    %c0_i32_1 = arith.constant 0 : i32
    %c0_i32_2 = arith.constant 0 : i32
    return %c0_i32, %c0_i32_0, %c0_i32_1 : i32, i32, i32
  }
  func.func @transform_5(%arg0: i32) -> (i32, i32, i32) {
    %c0_i32 = arith.constant 0 : i32
    %c0_i32_0 = arith.constant 0 : i32
    %c0_i32_1 = arith.constant 0 : i32
    %c0_i32_2 = arith.constant 0 : i32
    return %c0_i32, %c0_i32_0, %c0_i32_1 : i32, i32, i32
  }
  func.func @transform_6(%arg0: i32) -> (i32, i32) {
    %c0_i32 = arith.constant 0 : i32
    %c0_i32_0 = arith.constant 0 : i32
    %c0_i32_1 = arith.constant 0 : i32
    return %c0_i32, %c0_i32_0 : i32, i32
  }
  func.func @transform_7(%arg0: i32) -> (i32, i32) {
    %c0_i32 = arith.constant 0 : i32
    %c0_i32_0 = arith.constant 0 : i32
    %c0_i32_1 = arith.constant 0 : i32
    return %c0_i32, %c0_i32_0 : i32, i32
  }
}

</mosaic_0001>

<bundles_post_ra>
// kernel: tpu_custom_call.1
= control target key start
LH: loop header
LB: loop body
LE: loop exit
PB: predicated region body
PF: predicated region fallthrough
CT: control target
= control target key end

     0   :  { %vm48_vm0 = vcmask 261120   ;;  %s5598_s0 = inlined_call_operand.vmem [shape: f32[16,32], index: 0, kind: input, shape index: {}]   ;;  %s5599_s1 = inlined_call_operand.vmem [shape: f32[32,32], index: 1, kind: input, shape index: {}]   ;;  %s5600_s2 = inlined_call_operand.vmem [shape: f32[32,32], index: 2, kind: input, shape index: {}]   ;;  %s5601_s3 = inlined_call_operand.vmem [shape: f32[15,32,8], index: 3, kind: input, shape index: {}]   ;;  %s5602_s4 = inlined_call_operand.vmem [shape: f32[15,1,8], index: 4, kind: input, shape index: {}]   ;;  %s5603_s5 = inlined_call_operand.vmem [shape: f32[5,8,32], index: 5, kind: input, shape index: {}]   ;;  %s5604_s6 = inlined_call_operand.vmem [shape: f32[1,32], index: 6, kind: input, shape index: {}]   ;;  %s5605_s7 = inlined_call_operand.hbm [shape: f32[16,32], index: 7, kind: output, shape index: {}]  }
   0x1   :  { %v3893_v0 = vld [vmem:[%s5601_s3 + $0xa0] sm:$0xff]  ;;  %v3894_v1 = vld [vmem:[%s5601_s3 + $0xa8] sm:$0xff]  ;;  %v3895_v2 = vld [vmem:[%s5601_s3 + $0xb0] sm:$0xff] }
   0x2   :  { %v4663_v3 = vpack.c.bf16 %v3894_v1, %v3893_v0  ;;  %v3896_v4 = vld [vmem:[%s5601_s3 + $0xb8] sm:$0xff]  ;;  %v4984_v5 = vld [vmem:[%s5599_s1] sm:$0xff]  ;;  %v38_v8 = vld [vmem:[%s5601_s3 + $0x8] sm:$0xff] }
   0x3   :  { %v37_v6 = vld [vmem:[%s5601_s3] sm:$0xff]  ;;  %v4667_v7 = vpack.c.bf16 %v3896_v4, %v3895_v2  ;;  %4289 = vmatprep.mubr.msk.f32.mxu1 %vm48_vm0, %v4984_v5  ;;  %v39_v10 = vld [vmem:[%s5601_s3 + $0x10] sm:$0xff]  ;;  %v40_v11 = vld [vmem:[%s5601_s3 + $0x18] sm:$0xff] }
   0x4   :  { %4664 = vmatprep.subr.bf16.mxu1 %v4663_v3  ;;  %v4655_v9 = vpack.c.bf16 %v38_v8, %v37_v6  ;;  %v4659_v12 = vpack.c.bf16 %v40_v11, %v39_v10  ;;  %v5003_v13 = vld [vmem:[%s5598_s0] sm:$0xff]  ;;  %v3904_v15 = vld [vmem:[%s5601_s3 + $0x148] sm:$0xff] }
   0x5   :  { %4666 = vmatpush3.bf16.msra.mxu1 %v4663_v3  ;;  %v3903_v14 = vld [vmem:[%s5601_s3 + $0x140] sm:$0xff] }
   0x6   :  { %4668 = vmatprep.subr.bf16.mxu1 %v4667_v7  ;;  %4656 = vmatprep.subr.bf16.mxu0 %v4655_v9 }
   0x7   :  { %12 = vsyncpa [#allocation3], 0  ;;  %4658 = vmatpush3.bf16.msra.mxu0 %v4655_v9  ;;  %4278 = vmatprep.mubr.msk.f32.mxu0 %vm48_vm0, %v5003_v13  ;;  %v4671_v16 = vpack.c.bf16 %v3904_v15, %v3903_v14  ;;  %v5016_v17 = vld [vmem:[%s5599_s1 + $0x8] sm:$0xff]  ;;  %v5021_v18 = vld [vmem:[%s5599_s1 + $0x10] sm:$0xff]  ;;  %v4923_v24 = vmov 0.0|0.0   ;;  %vm4924_vm1 = vmmov 0  }
   0x8   :  { %4660 = vmatprep.subr.bf16.mxu0 %v4659_v12  ;;  %v5026_v19 = vld [vmem:[%s5598_s0 + $0x8] sm:$0xff]  ;;  %v5035_v20 = vld [vmem:[%s5599_s1 + $0x18] sm:$0xff]  ;;  %v3905_v21 = vld [vmem:[%s5601_s3 + $0x150] sm:$0xff]  ;;  %v4925_v29 = vmov 0.0   ;;  %vm351_vm2 = vcmask 64512   ;;  %vm431_vm4 = vcmask 130048  }
   0x9   :  { %4670 = vmatpush3.bf16.msra.mxu1 %v4667_v7  ;;  %v3906_v22 = vld [vmem:[%s5601_s3 + $0x158] sm:$0xff]  ;;  %v5052_v25 = vld [vmem:[%s5600_s2] sm:$0xff]  ;;  %v5059_v26 = vld [vmem:[%s5600_s2 + $0x8] sm:$0xff] }
   0xa   :  { %v4675_v23 = vpack.c.bf16 %v3906_v22, %v3905_v21  ;;  %4679 = vmatprep.subr.bf16.mxu1 %v4923_v24  ;;  %v5066_v27 = vld [vmem:[%s5600_s2 + $0x10] sm:$0xff]  ;;  %v5071_v28 = vld [vmem:[%s5600_s2 + $0x18] sm:$0xff]  ;;  %v3898_v30 = vld [vmem:[%s5602_s4 + $0x5] ss:$0 sm:$0xff] }
   0xb   :  { %4662 = vmatpush3.bf16.msra.mxu0 %v4659_v12  ;;  %vm5086_vm3 = vmpackc.low %vm351_vm2, %vm351_vm2  ;;  %v3890_v43 = vld [vmem:[%s5602_s4] ss:$0 sm:$0xff]  ;;  %v3908_v47 = vld [vmem:[%s5602_s4 + $0xa] ss:$0 sm:$0xff] }
   0xc   :  { %4290 = vmatmul.mubr.msk.f32.vlgmr.msra.gmra.mrb[0].mxu1 %vm48_vm0, %v5016_v17  ;;  %4672 = vmatprep.subr.bf16.mxu0 %v4671_v16  ;;  %v3921_v11 = vld [vmem:[%s5601_s3 + $0x20] sm:$0xff]  ;;  %v3922_v12 = vld [vmem:[%s5601_s3 + $0x28] sm:$0xff]  ;;  %v3923_v15 = vld [vmem:[%s5601_s3 + $0x30] sm:$0xff] }
   0xd   :  { %4292 = vmatprep.mubr.msk.f32.mxu1 %vm48_vm0, %v5021_v18  ;;  %v4693_v14 = vpack.c.bf16 %v3922_v12, %v3921_v11 }
   0xe   :  { %4279 = vmatmul.mubr.msk.f32.vlgmr.msra.gmra.mrb[0].mxu0 %vm48_vm0, %v5026_v19 }
   0xf   :  { %4674 = vmatpush3.bf16.msra.mxu0 %v4671_v16  ;;  %4303 = vmatprep.mubr.msk.f32.mxu0 %vm48_vm0, %v5052_v25  ;;  %v3924_v16 = vld [vmem:[%s5601_s3 + $0x38] sm:$0xff] }
  0x10   :  { %4293 = vmatmul.mubr.msk.f32.gmra.mrb[2].mxu1 %vm48_vm0, %v5035_v20  ;;  %4676 = vmatprep.subr.bf16.mxu0 %v4675_v23  ;;  %v4697_v21 = vpack.c.bf16 %v3924_v16, %v3923_v15 }
  0x11   :  { %4313 = vmatprep.mubr.msk.f32.mxu1 %vm4924_vm1, %v4925_v29 }
  0x13   :  { %4678 = vmatpush3.bf16.msra.mxu0 %v4675_v23 }
  0x14   :  { %4686 = vmatprep.subr.bf16.mxu0 %v4923_v24 }
  0x16   :  { %4304 = vmatmul.mubr.msk.f32.vlgmr.msra.gmra.mrb[2].mxu0 %vm48_vm0, %v5059_v26 }
  0x17   :  { %4306 = vmatprep.mubr.msk.f32.mxu0 %vm48_vm0, %v5066_v27 }
  0x1a   :  { %4307 = vmatmul.mubr.msk.f32.gmra.mrb[4].mxu0 %vm48_vm0, %v5071_v28 }
  0x1b   :  { %4327 = vmatprep.mubr.msk.f32.mxu0 %vm4924_vm1, %v4925_v29 }
  0xdf   :  { %v4291_v31 = vpop.f32.mrb[0].mxu1 }
  0xe0   :  { %v227_v32 = vadd.f32 %v4291_v31, %v3898_v30  ;;  %v221_v33 = vpop.f32.mrb[1].mxu1  ;;  %v3930_v31 = vld [vmem:[%s5601_s3 + $0xc8] sm:$0xff] }
  0xe1   :  { %v222_v34 = vadd.f32 %v3898_v30, %v221_v33  ;;  %v4280_v35 = vpop.f32.mrb[0].mxu0 }
  0xe2   :  { %v121_v37 = vpop.f32.mrb[1].mxu0  ;;  %v127_v46 = vadd.f32 %v4280_v35, %v3890_v43  ;;  %v3931_v35 = vld [vmem:[%s5601_s3 + $0xd0] sm:$0xff] }
  0xe3   :  { %v4680_v38 = vpack.c.bf16 %v227_v32, %v222_v34  ;;  %v4294_v39 = vpop.f32.mrb[2].mxu1  ;;  %v122_v45 = vadd.f32 %v3890_v43, %v121_v37  ;;  %v3932_v37 = vld [vmem:[%s5601_s3 + $0xd8] sm:$0xff] }
  0xe4   :  { %v237_v40 = vadd.f32 %v4294_v39, %v3898_v30  ;;  %v231_v41 = vpop.f32.mrb[3].mxu1 }
  0xe5   :  { %v232_v42 = vadd.f32 %v3898_v30, %v231_v41  ;;  %4682 = vmatpush3.bf16.xpose.msk.msra.mxu1 %vm5086_vm3, %v4680_v38  ;;  %v3929_v30 = vld [vmem:[%s5601_s3 + $0xc0] sm:$0xff] }
  0xe6   :  { %4683 = vmatprep.subr.bf16.mxu1 %v4923_v24  ;;  %v4701_v34 = vpack.c.bf16 %v3930_v31, %v3929_v30  ;;  %v3926_v41 = vld [vmem:[%s5602_s4 + $0x1] ss:$0 sm:$0xff] }
  0xe7   :  { %v4687_v44 = vpack.c.bf16 %v237_v40, %v232_v42  ;;  %v4705_v40 = vpack.c.bf16 %v3932_v37, %v3931_v35 }
  0xe9   :  { %4689 = vmatpush3.bf16.xpose.msk.msra.mxu0 %vm5086_vm3, %v4687_v44  ;;  %v4305_v48 = vpop.f32.mrb[2].mxu0 }
  0xea   :  { %v337_v49 = vadd.f32 %v4305_v48, %v3908_v47  ;;  %v331_v50 = vpop.f32.mrb[3].mxu0  ;;  %4694 = vmatprep.subr.bf16.mxu0 %v4693_v14 }
  0xeb   :  { %v332_v51 = vadd.f32 %v3908_v47, %v331_v50 }
  0xec   :  { %4314 = vmatmul.mubr.msk.f32.vlgmr.msra.gmra.mrb[4].mxu1 %vm351_vm2, %v122_v45 }
  0xed   :  { %4320 = vmatprep.mubr.msk.f32.mxu1 %vm4924_vm1, %v4925_v29  ;;  %v4684_v52 = vpack.c.bf16 %v337_v49, %v332_v51  ;;  %v4308_v53 = vpop.f32.mrb[4].mxu0  ;;  %v3934_v49 = vld [vmem:[%s5602_s4 + $0x6] ss:$0 sm:$0xff] }
  0xee   :  { %v347_v54 = vadd.f32 %v4308_v53, %v3908_v47  ;;  %v341_v55 = vpop.f32.mrb[5].mxu0 }
  0xef   :  { %v342_v56 = vadd.f32 %v3908_v47, %v341_v55  ;;  %4685 = vmatpush3.bf16.msra.mxu1 %v4684_v52 }
  0xf0   :  { %4328 = vmatmul.mubr.msk.f32.vlgmr.msra.gmra.mrb[6].mxu0 %vm351_vm2, %v127_v46  ;;  %4690 = vmatprep.subr.bf16.mxu1 %v4923_v24 }
  0xf1   :  { %4345 = vmatprep.mubr.msk.f32.mxu0 %vm48_vm0, %v5003_v13  ;;  %v4691_v57 = vpack.c.bf16 %v347_v54, %v342_v56  ;;  %4696 = vmatpush3.bf16.msra.mxu0 %v4693_v14  ;;  %v3944_v14 = vld [vmem:[%s5602_s4 + $0xb] ss:$0 sm:$0xff] }
  0xf2   :  { %4698 = vmatprep.subr.bf16.mxu0 %v4697_v21 }
  0xf5   :  { %4700 = vmatpush3.bf16.msra.mxu0 %v4697_v21 }
  0xf8   :  { %4346 = vmatmul.mubr.msk.f32.vlgmr.msra.gmra.mrb[8].mxu0 %vm48_vm0, %v5026_v19 }
  0xf9   :  { %4370 = vmatprep.mubr.msk.f32.mxu0 %vm48_vm0, %v5052_v25 }
 0x1bf   :  { %v427_v58 = vpop.f32.mrb[4].mxu1 }
 0x1c0   :  { %v4315_v59 = vpop.f32.mrb[5].mxu1  ;;  %v432_v60 = vsel %vm431_vm4, %v427_v58, -inf }
 0x1c1   :  { %433 = vmax.xlane.f32.xlu0 %v432_v60 }
 0x1c3   :  { %v591_v61 = vpop.f32.mrb[6].mxu0 }
 0x1c4   :  { %v4329_v62 = vpop.f32.mrb[7].mxu0  ;;  %v595_v63 = vsel %vm431_vm4, %v591_v61, -inf }
 0x1c5   :  { %596 = vmax.xlane.f32.xlu0 %v595_v63  ;;  %v3940_v62 = vld [vmem:[%s5601_s3 + $0x168] sm:$0xff]  ;;  %v3941_v63 = vld [vmem:[%s5601_s3 + $0x170] sm:$0xff] }
 0x1cb   :  { %v4347_v42 = vpop.f32.mrb[8].mxu0 }
 0x1cc   :  { %v5158_v43 = vadd.f32 %v4347_v42, %v3926_v41  ;;  %v758_v44 = vpop.f32.mrb[9].mxu0 }
 0x1cd   :  { %v759_v60 = vadd.f32 %v3926_v41, %v758_v44 }
 0x24e   :  { %v434_v0 = vpop.xlane.xlu0 %433 }
 0x24f   :  { %v435_v1 = vsub.f32 %v427_v58, %v434_v0 }
 0x251   :  { %v436_v2 = vmul.f32 1.442695, %v435_v1  ;;  %v3942_v1 = vld [vmem:[%s5601_s3 + $0x178] sm:$0xff] }
 0x252   :  { %v597_v3 = vpop.xlane.xlu0 %596 }
 0x253   :  { %4851 = vpow2.f32 %v436_v2  ;;  %v598_v4 = vsub.f32 %v591_v61, %v597_v3  ;;  %v3939_v61 = vld [vmem:[%s5601_s3 + $0x160] sm:$0xff]  ;;  %v4713_v2 = vpack.c.bf16 %v3942_v1, %v3941_v63 }
 0x254   :  { %v4709_v0 = vpack.c.bf16 %v3940_v62, %v3939_v61  ;;  %v3973_v61 = vld [vmem:[%s5601_s3 + $0xf8] sm:$0xff] }
 0x255   :  { %v599_v6 = vmul.f32 1.442695, %v598_v4 }
 0x256   :  { %4710 = vmatprep.subr.bf16.mxu0 %v4709_v0 }
 0x257   :  { %4853 = vpow2.f32 %v599_v6  ;;  %4712 = vmatpush3.bf16.msra.mxu0 %v4709_v0 }
 0x258   :  { %4714 = vmatprep.subr.bf16.mxu0 %v4713_v2 }
 0x25b   :  { %4716 = vmatpush3.bf16.msra.mxu0 %v4713_v2  ;;  %v3962_v2 = vld [vmem:[%s5601_s3 + $0x40] sm:$0xff] }
 0x25c   :  { %4390 = vmatprep.subr.mxu0 %v4925_v29 }
 0x25d   :  { %v4852_v7 = vpop.eup %4851 }
 0x25e   :  { %v438_v8 = vsel %vm431_vm4, %v4852_v7, 0.0  ;;  %4371 = vmatmul.mubr.msk.f32.vlgmr.msra.gmra.mrb[10].mxu0 %vm48_vm0, %v5059_v26 }
 0x25f   :  { %439 = vadd.xlane.f32.xlu1 %v438_v8  ;;  %4373 = vmatprep.mubr.msk.f32.mxu0 %vm48_vm0, %v5066_v27 }
 0x261   :  { %v4854_v9 = vpop.eup %4853 }
 0x262   :  { %v601_v10 = vsel %vm431_vm4, %v4854_v9, 0.0  ;;  %4374 = vmatmul.mubr.msk.f32.gmra.mrb[12].mxu0 %vm48_vm0, %v5071_v28 }
 0x263   :  { %602 = vadd.xlane.f32.xlu1 %v601_v10  ;;  %4392 = vmatprep.mubr.msk.f32.mxu0 %vm4924_vm1, %v4925_v29 }
 0x2ec   :  { %v440_v22 = vpop.xlane.xlu1 %439 }
 0x2ed   :  { %4855 = vrcp.f32 %v440_v22 }
 0x2f0   :  { %v603_v23 = vpop.xlane.xlu1 %602 }
 0x2f1   :  { %4857 = vrcp.f32 %v603_v23  ;;  %v5209_v23 = vld [vmem:[%s5603_s5 + $0x8] sm:$0xff] }
 0x2f2   :  { %4391 = vmatpush3.msra.mxu0 %v5209_v23 }
 0x2f3   :  { %4724 = vmatprep.subr.bf16.mxu0 %v4923_v24 }
 0x2f7   :  { %v4856_v32 = vpop.eup %4855 }
 0x2f8   :  { %v442_v33 = vmul.f32 %v4856_v32, %v4852_v7 }
 0x2fa   :  { %4321 = vmatmul.mubr.msk.f32.vlgmr.msra.gmra.mrb[6].mxu1 %vm431_vm4, %v442_v33  ;;  %v350_v33 = vld [vmem:[%s5603_s5] sm:$0xff] }
 0x2fb   :  { %v4858_v38 = vpop.eup %4857  ;;  %4692 = vmatpush3.bf16.msra.mxu1 %v4691_v57  ;;  %4334 = vmatprep.mubr.msk.f32.mxu1 %vm4924_vm1, %v4925_v29 }
 0x2fc   :  { %v605_v39 = vmul.f32 %v4858_v38, %v4854_v9  ;;  %4702 = vmatprep.subr.bf16.mxu1 %v4701_v34 }
 0x2fe   :  { %4335 = vmatmul.mubr.msk.f32.vlgmr.msra.gmra.mrb[8].mxu1 %vm431_vm4, %v605_v39 }
 0x2ff   :  { %4704 = vmatpush3.bf16.msra.mxu1 %v4701_v34  ;;  %4356 = vmatprep.mubr.msk.f32.mxu1 %vm48_vm0, %v4984_v5 }
 0x300   :  { %4706 = vmatprep.subr.bf16.mxu1 %v4705_v40 }
 0x303   :  { %4708 = vmatpush3.bf16.msra.mxu1 %v4705_v40 }
 0x304   :  { %4717 = vmatprep.subr.bf16.mxu1 %v4923_v24 }
 0x306   :  { %4357 = vmatmul.mubr.msk.f32.vlgmr.msra.gmra.mrb[10].mxu1 %vm48_vm0, %v5016_v17 }
 0x307   :  { %4359 = vmatprep.mubr.msk.f32.mxu1 %vm48_vm0, %v5021_v18 }
 0x30a   :  { %4360 = vmatmul.mubr.msk.f32.gmra.mrb[12].mxu1 %vm48_vm0, %v5035_v20 }
 0x30b   :  { %4380 = vmatprep.mubr.msk.f32.mxu1 %vm4924_vm1, %v4925_v29 }
 0x331   :  { %v4372_v12 = vpop.f32.mrb[10].mxu0 }
 0x332   :  { %v944_v15 = vpop.f32.mrb[11].mxu0  ;;  %v950_v16 = vadd.f32 %v4372_v12, %v3944_v14  ;;  %v3964_v12 = vld [vmem:[%s5601_s3 + $0x50] sm:$0xff] }
 0x333   :  { %v945_v21 = vadd.f32 %v3944_v14, %v944_v15 }
 0x335   :  { %v4722_v22 = vpack.c.bf16 %v950_v16, %v945_v21  ;;  %v4375_v34 = vpop.f32.mrb[12].mxu0 }
 0x336   :  { %v960_v35 = vadd.f32 %v4375_v34, %v3944_v14  ;;  %v954_v37 = vpop.f32.mrb[13].mxu0 }
 0x337   :  { %v955_v38 = vadd.f32 %v3944_v14, %v954_v37  ;;  %v3965_v14 = vld [vmem:[%s5601_s3 + $0x58] sm:$0xff]  ;;  %v3967_v37 = vld [vmem:[%s5602_s4 + $0x2] ss:$0 sm:$0xff] }
 0x338   :  { %v4735_v15 = vpack.c.bf16 %v3965_v14, %v3964_v12 }
 0x339   :  { %v4729_v39 = vpack.c.bf16 %v960_v35, %v955_v38 }
 0x3cd   :  { %v5160_v45 = vpop.f32.mrb[6].mxu1 }
 0x3ce   :  { %v4322_v46 = vpop.f32.mrb[7].mxu1 }
 0x3d1   :  { %v5162_v47 = vpop.f32.mrb[8].mxu1 }
 0x3d2   :  { %v4336_v48 = vpop.f32.mrb[9].mxu1 }
 0x3d9   :  { %v4358_v50 = vpop.f32.mrb[10].mxu1 }
 0x3da   :  { %v852_v51 = vadd.f32 %v4358_v50, %v3934_v49  ;;  %v846_v52 = vpop.f32.mrb[11].mxu1 }
 0x3db   :  { %v847_v53 = vadd.f32 %v3934_v49, %v846_v52 }
 0x3dd   :  { %v4718_v54 = vpack.c.bf16 %v852_v51, %v847_v53  ;;  %v4361_v55 = vpop.f32.mrb[12].mxu1 }
 0x3de   :  { %v5167_v56 = vadd.f32 %v4361_v55, %v3934_v49  ;;  %v856_v57 = vpop.f32.mrb[13].mxu1 }
 0x3df   :  { %4720 = vmatpush3.bf16.xpose.msk.msra.mxu1 %vm5086_vm3, %v4718_v54  ;;  %v5171_v58 = vadd.f32 %v3934_v49, %v856_v57  ;;  %v3970_v57 = vld [vmem:[%s5601_s3 + $0xe0] sm:$0xff] }
 0x3e0   :  { %4721 = vmatprep.subr.bf16.mxu1 %v4923_v24 }
 0x3e1   :  { %v4725_v59 = vpack.c.bf16 %v5167_v56, %v5171_v58  ;;  %v3971_v58 = vld [vmem:[%s5601_s3 + $0xe8] sm:$0xff] }
 0x3e6   :  { %4381 = vmatmul.mubr.msk.f32.vlgmr.msra.gmra.mrb[14].mxu1 %vm351_vm2, %v759_v60  ;;  %v4739_v60 = vpack.c.bf16 %v3971_v58, %v3970_v57 }
 0x3e7   :  { %4387 = vmatprep.mubr.msk.f32.mxu1 %vm4924_vm1, %v4925_v29  ;;  %4723 = vmatpush3.bf16.msra.mxu1 %v4722_v22 }
 0x3e8   :  { %4395 = vmatprep.subr.mxu1 %v4925_v29 }
 0x4b9   :  { %v1040_v3 = vpop.f32.mrb[14].mxu1 }
 0x4ba   :  { %v4382_v4 = vpop.f32.mrb[15].mxu1  ;;  %v1044_v6 = vsel %vm431_vm4, %v1040_v3, -inf }
 0x4bb   :  { %1045 = vmax.xlane.f32.xlu0 %v1044_v6  ;;  %v3975_v6 = vld [vmem:[%s5602_s4 + $0x7] ss:$0 sm:$0xff] }
 0x548   :  { %v1046_v7 = vpop.xlane.xlu0 %1045 }
 0x549   :  { %v1047_v8 = vsub.f32 %v1040_v3, %v1046_v7  ;;  %v3963_v3 = vld [vmem:[%s5601_s3 + $0x48] sm:$0xff] }
 0x54a   :  { %v4731_v4 = vpack.c.bf16 %v3963_v3, %v3962_v2  ;;  %v3990_v2 = vld [vmem:[%s5603_s5 + $0x10] sm:$0xff] }
 0x54b   :  { %v1048_v9 = vmul.f32 1.442695, %v1047_v8 }
 0x54d   :  { %4859 = vpow2.f32 %v1048_v9 }
 0x557   :  { %v4860_v10 = vpop.eup %4859 }
 0x558   :  { %v1050_v11 = vsel %vm431_vm4, %v4860_v10, 0.0 }
 0x559   :  { %1051 = vadd.xlane.f32.xlu1 %v1050_v11 }
 0x5e6   :  { %v1052_v30 = vpop.xlane.xlu1 %1051 }
 0x5e7   :  { %4861 = vrcp.f32 %v1052_v30 }
 0x5f1   :  { %v4862_v31 = vpop.eup %4861 }
 0x5f2   :  { %v1054_v32 = vmul.f32 %v4862_v31, %v4860_v10 }
 0x5f4   :  { %4388 = vmatmul.mubr.msk.f32.vlgmr.msra.gmra.mrb[16].mxu1 %vm431_vm4, %v1054_v32 }
 0x5f5   :  { %4396 = vmatpush3.msra.mxu1 %v350_v33  ;;  %4397 = vmatprep.mubr.msk.f32.mxu1 %vm4924_vm1, %v4925_v29 }
 0x5f6   :  { %4728 = vmatprep.subr.bf16.mxu1 %v4923_v24 }
 0x5f8   :  { %4398 = vmatmul.mubr.msk.f32.vlgmr.msra.gmra.mrb[18].mxu1 %vm351_vm2, %v5160_v45 }
 0x5f9   :  { %4411 = vmatprep.mubr.msk.f32.mxu1 %vm4924_vm1, %v4925_v29  ;;  %4730 = vmatpush3.bf16.msra.mxu1 %v4729_v39 }
 0x5fa   :  { %4414 = vmatprep.subr.mxu1 %v4925_v29 }
 0x6c7   :  { %v1124_v40 = vpop.f32.mrb[16].mxu1 }
 0x6c8   :  { %v4389_v41 = vpop.f32.mrb[17].mxu1  ;;  %4393 = vmatmul.mubr.msk.f32.vlgmr.msra.gmra.mrb[14].mxu0 %vm351_vm2, %v1124_v40 }
 0x6c9   :  { %4727 = vmatpush3.bf16.xpose.msk.msra.mxu0 %vm5086_vm3, %v4725_v59  ;;  %4404 = vmatprep.mubr.msk.f32.mxu0 %vm4924_vm1, %v4925_v29  ;;  %v3972_v59 = vld [vmem:[%s5601_s3 + $0xf0] sm:$0xff] }
 0x6ca   :  { %4419 = vmatprep.subr.mxu0 %v4925_v29  ;;  %v4743_v62 = vpack.c.bf16 %v3973_v61, %v3972_v59 }
 0x6cb   :  { %v1270_v42 = vpop.f32.mrb[18].mxu1 }
 0x6cc   :  { %v4399_v44 = vpop.f32.mrb[19].mxu1 }
 0x6cd   :  { %v3981_v44 = vld [vmem:[%s5601_s3 + $0x188] sm:$0xff] }
 0x6d0   :  { %4405 = vmatmul.mubr.msk.f32.vlgmr.msra.gmra.mrb[16].mxu0 %vm351_vm2, %v5158_v43 }
 0x6d1   :  { %4420 = vmatpush3.msra.mxu0 %v350_v33  ;;  %4421 = vmatprep.mubr.msk.f32.mxu0 %vm4924_vm1, %v4925_v29 }
 0x6d2   :  { %4740 = vmatprep.subr.bf16.mxu0 %v4739_v60 }
 0x6d4   :  { %4422 = vmatmul.mubr.msk.f32.vlgmr.msra.gmra.mrb[18].mxu0 %vm351_vm2, %v5162_v47 }
 0x6d5   :  { %4443 = vmatprep.mubr.msk.f32.mxu0 %vm48_vm0, %v4984_v5  ;;  %4742 = vmatpush3.bf16.msra.mxu0 %v4739_v60 }
 0x6d6   :  { %4744 = vmatprep.subr.bf16.mxu0 %v4743_v62 }
 0x6d9   :  { %4746 = vmatpush3.bf16.msra.mxu0 %v4743_v62 }
 0x6da   :  { %4755 = vmatprep.subr.bf16.mxu0 %v4923_v24 }
 0x6dc   :  { %4444 = vmatmul.mubr.msk.f32.vlgmr.msra.gmra.mrb[20].mxu0 %vm48_vm0, %v5016_v17 }
 0x6dd   :  { %4446 = vmatprep.mubr.msk.f32.mxu0 %vm48_vm0, %v5021_v18 }
 0x6e0   :  { %4447 = vmatmul.mubr.msk.f32.gmra.mrb[22].mxu0 %vm48_vm0, %v5035_v20 }
 0x6e1   :  { %4467 = vmatprep.mubr.msk.f32.mxu0 %vm4924_vm1, %v4925_v29 }
 0x79b   :  { %v1197_v45 = vpop.f32.mrb[14].mxu0 }
 0x79c   :  { %v5239_v46 = vadd.f32 %v1270_v42, %v1197_v45  ;;  %v4394_v48 = vpop.f32.mrb[15].mxu0  ;;  %v3980_v42 = vld [vmem:[%s5601_s3 + $0x180] sm:$0xff]  ;;  %v3982_v45 = vld [vmem:[%s5601_s3 + $0x190] sm:$0xff] }
 0x79d   :  { %v4747_v48 = vpack.c.bf16 %v3981_v44, %v3980_v42  ;;  %v4003_v44 = vld [vmem:[%s5601_s3 + $0x70] sm:$0xff] }
 0x7a3   :  { %v1349_v49 = vpop.f32.mrb[16].mxu0 }
 0x7a4   :  { %v4406_v50 = vpop.f32.mrb[17].mxu0  ;;  %v1353_v51 = vsel %vm431_vm4, %v1349_v49, -inf }
 0x7a5   :  { %1354 = vmax.xlane.f32.xlu0 %v1353_v51 }
 0x7a7   :  { %v1579_v43 = vpop.f32.mrb[18].mxu0 }
 0x7a8   :  { %v4423_v52 = vpop.f32.mrb[19].mxu0 }
 0x7af   :  { %v4445_v7 = vpop.f32.mrb[20].mxu0 }
 0x7b0   :  { %v1756_v8 = vadd.f32 %v4445_v7, %v3975_v6  ;;  %v1750_v9 = vpop.f32.mrb[21].mxu0 }
 0x7b1   :  { %v1751_v10 = vadd.f32 %v3975_v6, %v1750_v9 }
 0x7b3   :  { %v4756_v11 = vpack.c.bf16 %v1756_v8, %v1751_v10  ;;  %v4448_v22 = vpop.f32.mrb[22].mxu0 }
 0x7b4   :  { %v1760_v30 = vpop.f32.mrb[23].mxu0 }
 0x7b5   :  { %4758 = vmatpush3.bf16.xpose.msk.msra.mxu0 %vm5086_vm3, %v4756_v11  ;;  %v1761_v31 = vadd.f32 %v3975_v6, %v1760_v30 }
 0x7b6   :  { %4759 = vmatprep.subr.bf16.mxu0 %v4923_v24 }
 0x832   :  { %v1355_v53 = vpop.xlane.xlu0 %1354 }
 0x833   :  { %v1356_v54 = vsub.f32 %v1349_v49, %v1355_v53  ;;  %v3983_v49 = vld [vmem:[%s5601_s3 + $0x198] sm:$0xff]  ;;  %v3985_v53 = vld [vmem:[%s5602_s4 + $0xc] ss:$0 sm:$0xff] }
 0x834   :  { %v4751_v50 = vpack.c.bf16 %v3983_v49, %v3982_v45  ;;  %v4004_v45 = vld [vmem:[%s5601_s3 + $0x78] sm:$0xff]  ;;  %v4011_v49 = vld [vmem:[%s5601_s3 + $0x110] sm:$0xff] }
 0x835   :  { %v1357_v55 = vmul.f32 1.442695, %v1356_v54 }
 0x837   :  { %4863 = vpow2.f32 %v1357_v55 }
 0x841   :  { %v4864_v56 = vpop.eup %4863 }
 0x842   :  { %v1359_v47 = vsel %vm431_vm4, %v4864_v56, 0.0 }
 0x843   :  { %1360 = vadd.xlane.f32.xlu1 %v1359_v47 }
 0x8d0   :  { %v1361_v63 = vpop.xlane.xlu1 %1360 }
 0x8d1   :  { %4865 = vrcp.f32 %v1361_v63 }
 0x8db   :  { %v4866_v0 = vpop.eup %4865 }
 0x8dc   :  { %v1363_v1 = vmul.f32 %v4866_v0, %v4864_v56 }
 0x8de   :  { %4412 = vmatmul.mubr.msk.f32.vlgmr.msra.gmra.mrb[20].mxu1 %vm431_vm4, %v1363_v1 }
 0x8df   :  { %4415 = vmatpush3.msra.mxu1 %v5209_v23  ;;  %4416 = vmatprep.mubr.msk.f32.mxu1 %vm4924_vm1, %v4925_v29  ;;  %v1766_v23 = vadd.f32 %v4448_v22, %v3975_v6 }
 0x8e0   :  { %4732 = vmatprep.subr.bf16.mxu1 %v4731_v4 }
 0x8e1   :  { %v4763_v32 = vpack.c.bf16 %v1766_v23, %v1761_v31 }
 0x9b1   :  { %v1433_v16 = vpop.f32.mrb[20].mxu1 }
 0x9b2   :  { %v4413_v21 = vpop.f32.mrb[21].mxu1  ;;  %4417 = vmatmul.mubr.msk.f32.vlgmr.msra.gmra.mrb[22].mxu1 %vm351_vm2, %v1433_v16 }
 0x9b3   :  { %4734 = vmatpush3.bf16.msra.mxu1 %v4731_v4  ;;  %4432 = vmatprep.mubr.msk.f32.mxu1 %vm48_vm0, %v5003_v13 }
 0x9b4   :  { %4736 = vmatprep.subr.bf16.mxu1 %v4735_v15 }
 0x9b7   :  { %4738 = vmatpush3.bf16.msra.mxu1 %v4735_v15 }
 0x9b8   :  { %4748 = vmatprep.subr.bf16.mxu1 %v4747_v48 }
 0x9ba   :  { %4433 = vmatmul.mubr.msk.f32.vlgmr.msra.gmra.mrb[24].mxu1 %vm48_vm0, %v5026_v19 }
 0x9bb   :  { %4457 = vmatprep.mubr.msk.f32.mxu1 %vm48_vm0, %v5052_v25  ;;  %4750 = vmatpush3.bf16.msra.mxu1 %v4747_v48  ;;  %v4773_v48 = vpack.c.bf16 %v4004_v45, %v4003_v44 }
 0x9bc   :  { %4752 = vmatprep.subr.bf16.mxu1 %v4751_v50 }
 0x9bf   :  { %4754 = vmatpush3.bf16.msra.mxu1 %v4751_v50  ;;  %v4012_v50 = vld [vmem:[%s5601_s3 + $0x118] sm:$0xff] }
 0x9c0   :  { %4477 = vmatprep.subr.mxu1 %v4925_v29 }
 0x9c2   :  { %4458 = vmatmul.mubr.msk.f32.vlgmr.msra.gmra.mrb[26].mxu1 %vm48_vm0, %v5059_v26 }
 0x9c3   :  { %4460 = vmatprep.mubr.msk.f32.mxu1 %vm48_vm0, %v5066_v27  ;;  %4478 = vmatpush3.msra.mxu1 %v3990_v2 }
 0x9c4   :  { %4766 = vmatprep.subr.bf16.mxu1 %v4923_v24 }
 0x9c6   :  { %4461 = vmatmul.mubr.msk.f32.gmra.mrb[28].mxu1 %vm48_vm0, %v5071_v28 }
 0x9c7   :  { %4479 = vmatprep.mubr.msk.f32.mxu1 %vm4924_vm1, %v4925_v29 }
 0xa85   :  { %v1506_v33 = vpop.f32.mrb[22].mxu1 }
 0xa86   :  { %v5293_v34 = vadd.f32 %v1579_v43, %v1506_v33  ;;  %v4418_v35 = vpop.f32.mrb[23].mxu1 }
 0xa8d   :  { %v4434_v38 = vpop.f32.mrb[24].mxu1 }
 0xa8e   :  { %v1668_v39 = vadd.f32 %v4434_v38, %v3967_v37  ;;  %v1662_v40 = vpop.f32.mrb[25].mxu1  ;;  %v4009_v38 = vld [vmem:[%s5601_s3 + $0x100] sm:$0xff] }
 0xa8f   :  { %v1663_v41 = vadd.f32 %v3967_v37, %v1662_v40  ;;  %v4001_v40 = vld [vmem:[%s5601_s3 + $0x60] sm:$0xff] }
 0xa91   :  { %4468 = vmatmul.mubr.msk.f32.vlgmr.msra.gmra.mrb[24].mxu0 %vm351_vm2, %v1663_v41  ;;  %v4002_v41 = vld [vmem:[%s5601_s3 + $0x68] sm:$0xff] }
 0xa92   :  { %4474 = vmatprep.mubr.msk.f32.mxu0 %vm4924_vm1, %v4925_v29  ;;  %v4769_v42 = vpack.c.bf16 %v4002_v41, %v4001_v40 }
 0xa95   :  { %v4459_v54 = vpop.f32.mrb[26].mxu1 }
 0xa96   :  { %v1854_v55 = vadd.f32 %v4459_v54, %v3985_v53  ;;  %v1848_v56 = vpop.f32.mrb[27].mxu1 }
 0xa97   :  { %v1849_v47 = vadd.f32 %v3985_v53, %v1848_v56 }
 0xa99   :  { %v4760_v57 = vpack.c.bf16 %v1854_v55, %v1849_v47  ;;  %v4462_v9 = vpop.f32.mrb[28].mxu1 }
 0xa9a   :  { %v1864_v10 = vadd.f32 %v4462_v9, %v3985_v53  ;;  %v1858_v11 = vpop.f32.mrb[29].mxu1 }
 0xa9b   :  { %4761 = vmatpush3.bf16.msra.mxu0 %v4760_v57  ;;  %v1859_v12 = vadd.f32 %v3985_v53, %v1858_v11  ;;  %v4024_v11 = vld [vmem:[%s5602_s4 + $0xd] ss:$0 sm:$0xff] }
 0xa9c   :  { %4762 = vmatprep.subr.bf16.mxu0 %v4923_v24 }
 0xa9d   :  { %v4767_v14 = vpack.c.bf16 %v1864_v10, %v1859_v12 }
 0xb64   :  { %v1944_v51 = vpop.f32.mrb[24].mxu0 }
 0xb65   :  { %v4469_v43 = vpop.f32.mrb[25].mxu0  ;;  %v1948_v52 = vsel %vm431_vm4, %v1944_v51, -inf }
 0xb66   :  { %1949 = vmax.xlane.f32.xlu0 %v1948_v52 }
 0xbf3   :  { %v1950_v58 = vpop.xlane.xlu0 %1949 }
 0xbf4   :  { %v1951_v59 = vsub.f32 %v1944_v51, %v1950_v58  ;;  %v4781_v51 = vpack.c.bf16 %v4012_v50, %v4011_v49 }
 0xbf6   :  { %v1952_v60 = vmul.f32 1.442695, %v1951_v59 }
 0xbf8   :  { %4867 = vpow2.f32 %v1952_v60 }
 0xc02   :  { %v4868_v61 = vpop.eup %4867 }
 0xc03   :  { %v1954_v62 = vsel %vm431_vm4, %v4868_v61, 0.0 }
 0xc04   :  { %1955 = vadd.xlane.f32.xlu1 %v1954_v62 }
 0xc91   :  { %v1956_v63 = vpop.xlane.xlu1 %1955 }
 0xc92   :  { %4869 = vrcp.f32 %v1956_v63 }
 0xc9c   :  { %v4870_v0 = vpop.eup %4869 }
 0xc9d   :  { %v1958_v1 = vmul.f32 %v4870_v0, %v4868_v61 }
 0xc9f   :  { %4475 = vmatmul.mubr.msk.f32.vlgmr.msra.gmra.mrb[26].mxu0 %vm431_vm4, %v1958_v1  ;;  %v4019_v1 = vld [vmem:[%s5601_s3 + $0x1a0] sm:$0xff] }
 0xca0   :  { %4765 = vmatpush3.bf16.xpose.msk.msra.mxu0 %vm5086_vm3, %v4763_v32  ;;  %4486 = vmatprep.mubr.msk.f32.mxu0 %vm4924_vm1, %v4925_v29 }
 0xca1   :  { %4770 = vmatprep.subr.bf16.mxu0 %v4769_v42 }
 0xca7   :  { %4487 = vmatmul.mubr.msk.f32.vlgmr.msra.gmra.mrb[28].mxu0 %vm351_vm2, %v1668_v39 }
 0xca8   :  { %4509 = vmatprep.mubr.msk.f32.mxu0 %vm48_vm0, %v5003_v13  ;;  %4772 = vmatpush3.bf16.msra.mxu0 %v4769_v42 }
 0xca9   :  { %4774 = vmatprep.subr.bf16.mxu0 %v4773_v48 }
 0xcac   :  { %4776 = vmatpush3.bf16.msra.mxu0 %v4773_v48 }
 0xcaf   :  { %4510 = vmatmul.mubr.msk.f32.vlgmr.msra.gmra.mrb[30].mxu0 %vm48_vm0, %v5026_v19 }
 0xcb0   :  { %4534 = vmatprep.mubr.msk.f32.mxu0 %vm48_vm0, %v5052_v25 }
 0xd72   :  { %v2028_v3 = vpop.f32.mrb[26].mxu0 }
 0xd73   :  { %v4476_v4 = vpop.f32.mrb[27].mxu0  ;;  %4480 = vmatmul.mubr.msk.f32.vlgmr.msra.gmra.mrb[30].mxu1 %vm351_vm2, %v2028_v3  ;;  %v4021_v3 = vld [vmem:[%s5601_s3 + $0x1b0] sm:$0xff] }
 0xd74   :  { %4493 = vmatprep.mubr.msk.f32.mxu1 %vm4924_vm1, %v4925_v29  ;;  %4768 = vmatpush3.bf16.msra.mxu1 %v4767_v14 }
 0xd75   :  { %4496 = vmatprep.subr.mxu1 %v4925_v29 }
 0xd7a   :  { %v2181_v6 = vpop.f32.mrb[28].mxu0 }
 0xd7b   :  { %v4488_v7 = vpop.f32.mrb[29].mxu0  ;;  %v2185_v8 = vsel %vm431_vm4, %v2181_v6, -inf }
 0xd7c   :  { %2186 = vmax.xlane.f32.xlu0 %v2185_v8 }
 0xd82   :  { %v4511_v19 = vpop.f32.mrb[30].mxu0 }
 0xd83   :  { %v2422_v54 = vpop.f32.mrb[31].mxu0 }
 0xe09   :  { %v2187_v15 = vpop.xlane.xlu0 %2186 }
 0xe0a   :  { %v2188_v16 = vsub.f32 %v2181_v6, %v2187_v15  ;;  %v4022_v6 = vld [vmem:[%s5601_s3 + $0x1b8] sm:$0xff] }
 0xe0b   :  { %v4789_v7 = vpack.c.bf16 %v4022_v6, %v4021_v3  ;;  %v4894_v3 = vld [vmem:[%s5599_s1 + $0x10] sm:$0xff]  ;;  %v4045_v6 = vld [vmem:[%s5602_s4 + $0x4] ss:$0 sm:$0xff] }
 0xe0c   :  { %v2189_v21 = vmul.f32 1.442695, %v2188_v16 }
 0xe0e   :  { %4871 = vpow2.f32 %v2189_v21 }
 0xe18   :  { %v4872_v22 = vpop.eup %4871 }
 0xe19   :  { %v2191_v23 = vsel %vm431_vm4, %v4872_v22, 0.0 }
 0xe1a   :  { %2192 = vadd.xlane.f32.xlu1 %v2191_v23 }
 0xe46   :  { %v2101_v30 = vpop.f32.mrb[30].mxu1 }
 0xe47   :  { %v5347_v31 = vadd.f32 %v2101_v30, %v5239_v46  ;;  %v4481_v32 = vpop.f32.mrb[31].mxu1  ;;  %v4010_v46 = vld [vmem:[%s5601_s3 + $0x108] sm:$0xff] }
 0xe48   :  { %v4777_v39 = vpack.c.bf16 %v4010_v46, %v4009_v38 }
 0xea7   :  { %v2193_v33 = vpop.xlane.xlu1 %2192 }
 0xea8   :  { %4873 = vrcp.f32 %v2193_v33 }
 0xeb2   :  { %v4874_v35 = vpop.eup %4873 }
 0xeb3   :  { %v2195_v37 = vmul.f32 %v4874_v35, %v4872_v22  ;;  %v4029_v35 = vld [vmem:[%s5603_s5 + $0x18] sm:$0xff] }
 0xeb5   :  { %4494 = vmatmul.mubr.msk.f32.vlgmr.msra.gmra.mrb[32].mxu1 %vm431_vm4, %v2195_v37 }
 0xeb6   :  { %4497 = vmatpush3.msra.mxu1 %v3990_v2  ;;  %4498 = vmatprep.mubr.msk.f32.mxu1 %vm4924_vm1, %v4925_v29  ;;  %v4020_v2 = vld [vmem:[%s5601_s3 + $0x1a8] sm:$0xff] }
 0xeb7   :  { %4778 = vmatprep.subr.bf16.mxu1 %v4777_v39  ;;  %v4785_v4 = vpack.c.bf16 %v4020_v2, %v4019_v1  ;;  %v4892_v2 = vld [vmem:[%s5599_s1] sm:$0xff] }
 0xeb9   :  { %4786 = vmatprep.subr.bf16.mxu0 %v4785_v4 }
 0xeba   :  { %4788 = vmatpush3.bf16.msra.mxu0 %v4785_v4  ;;  %v4895_v4 = vld [vmem:[%s5599_s1 + $0x18] sm:$0xff] }
 0xebb   :  { %4790 = vmatprep.subr.bf16.mxu0 %v4789_v7 }
 0xebe   :  { %4792 = vmatpush3.bf16.msra.mxu0 %v4789_v7 }
 0xebf   :  { %4554 = vmatprep.subr.mxu0 %v4925_v29 }
 0xec1   :  { %4535 = vmatmul.mubr.msk.f32.vlgmr.msra.gmra.mrb[32].mxu0 %vm48_vm0, %v5059_v26 }
 0xec2   :  { %4537 = vmatprep.mubr.msk.f32.mxu0 %vm48_vm0, %v5066_v27  ;;  %4555 = vmatpush3.msra.mxu0 %v4029_v35 }
 0xec3   :  { %4804 = vmatprep.subr.bf16.mxu0 %v4923_v24 }
 0xec5   :  { %4538 = vmatmul.mubr.msk.f32.gmra.mrb[34].mxu0 %vm48_vm0, %v5071_v28 }
 0xec6   :  { %4556 = vmatprep.mubr.msk.f32.mxu0 %vm4924_vm1, %v4925_v29 }
 0xf88   :  { %v2265_v43 = vpop.f32.mrb[32].mxu1 }
 0xf89   :  { %v4495_v52 = vpop.f32.mrb[33].mxu1  ;;  %4499 = vmatmul.mubr.msk.f32.vlgmr.msra.gmra.mrb[34].mxu1 %vm351_vm2, %v2265_v43 }
 0xf8a   :  { %4780 = vmatpush3.bf16.msra.mxu1 %v4777_v39  ;;  %4520 = vmatprep.mubr.msk.f32.mxu1 %vm48_vm0, %v4984_v5  ;;  %v4006_v5 = vld [vmem:[%s5602_s4 + $0x3] ss:$0 sm:$0xff] }
 0xf8b   :  { %4782 = vmatprep.subr.bf16.mxu1 %v4781_v51  ;;  %v2428_v53 = vadd.f32 %v4511_v19, %v4006_v5  ;;  %v2423_v0 = vadd.f32 %v4006_v5, %v2422_v54 }
 0xf8e   :  { %4784 = vmatpush3.bf16.msra.mxu1 %v4781_v51 }
 0xf8f   :  { %4793 = vmatprep.subr.bf16.mxu1 %v4923_v24 }
 0xf91   :  { %4521 = vmatmul.mubr.msk.f32.vlgmr.msra.gmra.mrb[36].mxu1 %vm48_vm0, %v5016_v17 }
 0xf92   :  { %4523 = vmatprep.mubr.msk.f32.mxu1 %vm48_vm0, %v5021_v18  ;;  %v4014_v18 = vld [vmem:[%s5602_s4 + $0x8] ss:$0 sm:$0xff] }
 0xf94   :  { %v4536_v12 = vpop.f32.mrb[32].mxu0 }
 0xf95   :  { %4524 = vmatmul.mubr.msk.f32.gmra.mrb[38].mxu1 %vm48_vm0, %v5035_v20  ;;  %v2614_v26 = vadd.f32 %v4536_v12, %v4024_v11  ;;  %v2608_v14 = vpop.f32.mrb[33].mxu0 }
 0xf96   :  { %4544 = vmatprep.mubr.msk.f32.mxu1 %vm4924_vm1, %v4925_v29  ;;  %v2609_v15 = vadd.f32 %v4024_v11, %v2608_v14 }
 0xf98   :  { %v4798_v27 = vpack.c.bf16 %v2614_v26, %v2609_v15  ;;  %v4053_v26 = vld [vmem:[%s5602_s4 + $0x9] ss:$0 sm:$0xff] }
0x105c   :  { %v2338_v55 = vpop.f32.mrb[34].mxu1 }
0x105d   :  { %v5396_v56 = vadd.f32 %v2338_v55, %v5293_v34  ;;  %v4500_v17 = vpop.f32.mrb[35].mxu1 }
0x105e   :  { %v4048_v17 = vld [vmem:[%s5601_s3 + $0x120] sm:$0xff] }
0x1064   :  { %v4522_v20 = vpop.f32.mrb[36].mxu1 }
0x1065   :  { %v2516_v47 = vadd.f32 %v4522_v20, %v4014_v18  ;;  %v2510_v57 = vpop.f32.mrb[37].mxu1  ;;  %v4040_v20 = vld [vmem:[%s5601_s3 + $0x80] sm:$0xff] }
0x1066   :  { %v2511_v58 = vadd.f32 %v4014_v18, %v2510_v57 }
0x1068   :  { %v4794_v59 = vpack.c.bf16 %v2516_v47, %v2511_v58  ;;  %v4525_v60 = vpop.f32.mrb[38].mxu1  ;;  %v4041_v47 = vld [vmem:[%s5601_s3 + $0x88] sm:$0xff]  ;;  %v4042_v58 = vld [vmem:[%s5601_s3 + $0x90] sm:$0xff] }
0x1069   :  { %v2526_v61 = vadd.f32 %v4525_v60, %v4014_v18  ;;  %v2520_v62 = vpop.f32.mrb[39].mxu1  ;;  %v4807_v57 = vpack.c.bf16 %v4041_v47, %v4040_v20  ;;  %v4068_v47 = vld [vmem:[%s5603_s5 + $0x20] sm:$0xff] }
0x106a   :  { %4796 = vmatpush3.bf16.xpose.msk.msra.mxu1 %vm5086_vm3, %v4794_v59  ;;  %v2521_v63 = vadd.f32 %v4014_v18, %v2520_v62  ;;  %v4043_v59 = vld [vmem:[%s5601_s3 + $0x98] sm:$0xff]  ;;  %v4050_v62 = vld [vmem:[%s5601_s3 + $0x130] sm:$0xff] }
0x106b   :  { %4797 = vmatprep.subr.bf16.mxu1 %v4923_v24  ;;  %v4811_v60 = vpack.c.bf16 %v4043_v59, %v4042_v58 }
0x106c   :  { %v4801_v34 = vpack.c.bf16 %v2526_v61, %v2521_v63  ;;  %v4891_v61 = vld [vmem:[%s5598_s0 + $0x8] sm:$0xff]  ;;  %v4051_v63 = vld [vmem:[%s5601_s3 + $0x138] sm:$0xff] }
0x1071   :  { %4545 = vmatmul.mubr.msk.f32.vlgmr.msra.gmra.mrb[40].mxu1 %vm351_vm2, %v2423_v0 }
0x1072   :  { %4551 = vmatprep.mubr.msk.f32.mxu1 %vm4924_vm1, %v4925_v29  ;;  %4799 = vmatpush3.bf16.msra.mxu1 %v4798_v27 }
0x1073   :  { %4800 = vmatprep.subr.bf16.mxu1 %v4923_v24 }
0x1144   :  { %v2704_v8 = vpop.f32.mrb[40].mxu1 }
0x1145   :  { %v4546_v9 = vpop.f32.mrb[41].mxu1  ;;  %v2708_v10 = vsel %vm431_vm4, %v2704_v8, -inf }
0x1146   :  { %2709 = vmax.xlane.f32.xlu0 %v2708_v10 }
0x11d3   :  { %v2710_v28 = vpop.xlane.xlu0 %2709 }
0x11d4   :  { %v2711_v16 = vsub.f32 %v2704_v8, %v2710_v28 }
0x11d6   :  { %v2712_v21 = vmul.f32 1.442695, %v2711_v16 }
0x11d8   :  { %4875 = vpow2.f32 %v2712_v21 }
0x11e2   :  { %v4876_v22 = vpop.eup %4875 }
0x11e3   :  { %v2714_v23 = vsel %vm431_vm4, %v4876_v22, 0.0 }
0x11e4   :  { %2715 = vadd.xlane.f32.xlu1 %v2714_v23 }
0x1271   :  { %v2716_v30 = vpop.xlane.xlu1 %2715 }
0x1272   :  { %4877 = vrcp.f32 %v2716_v30 }
0x127c   :  { %v4878_v32 = vpop.eup %4877 }
0x127d   :  { %v2718_v33 = vmul.f32 %v4878_v32, %v4876_v22 }
0x127f   :  { %4552 = vmatmul.mubr.msk.f32.vlgmr.msra.gmra.mrb[42].mxu1 %vm431_vm4, %v2718_v33  ;;  %v4058_v33 = vld [vmem:[%s5601_s3 + $0x1c0] sm:$0xff] }
0x1280   :  { %4803 = vmatpush3.bf16.xpose.msk.msra.mxu1 %vm5086_vm3, %v4801_v34  ;;  %4563 = vmatprep.mubr.msk.f32.mxu1 %vm4924_vm1, %v4925_v29  ;;  %v4819_v34 = vpack.c.bf16 %v4051_v63, %v4050_v62 }
0x1281   :  { %4808 = vmatprep.subr.bf16.mxu1 %v4807_v57 }
0x1287   :  { %4564 = vmatmul.mubr.msk.f32.vlgmr.msra.gmra.mrb[44].mxu1 %vm351_vm2, %v2428_v53 }
0x1288   :  { %4586 = vmatprep.mubr.msk.f32.mxu1 %vm48_vm0, %v5003_v13  ;;  %v4539_v13 = vpop.f32.mrb[34].mxu0  ;;  %4810 = vmatpush3.bf16.msra.mxu1 %v4807_v57 }
0x1289   :  { %v2624_v41 = vadd.f32 %v4539_v13, %v4024_v11  ;;  %v2618_v42 = vpop.f32.mrb[35].mxu0  ;;  %4812 = vmatprep.subr.bf16.mxu1 %v4811_v60  ;;  %v4897_v13 = vld [vmem:[%s5600_s2 + $0x10] sm:$0xff] }
0x128a   :  { %v2619_v44 = vadd.f32 %v4024_v11, %v2618_v42 }
0x128c   :  { %v4805_v45 = vpack.c.bf16 %v2624_v41, %v2619_v44  ;;  %4814 = vmatpush3.bf16.msra.mxu1 %v4811_v60  ;;  %v4898_v41 = vld [vmem:[%s5600_s2 + $0x18] sm:$0xff] }
0x128f   :  { %4587 = vmatmul.mubr.msk.f32.vlgmr.msra.gmra.mrb[46].mxu1 %vm48_vm0, %v4891_v61 }
0x1290   :  { %4611 = vmatprep.mubr.msk.f32.mxu1 %vm48_vm0, %v5052_v25  ;;  %v4893_v25 = vld [vmem:[%s5599_s1 + $0x8] sm:$0xff] }
0x1352   :  { %v2788_v37 = vpop.f32.mrb[42].mxu1 }
0x1353   :  { %v4553_v38 = vpop.f32.mrb[43].mxu1  ;;  %4557 = vmatmul.mubr.msk.f32.vlgmr.msra.gmra.mrb[36].mxu0 %vm351_vm2, %v2788_v37  ;;  %v4060_v37 = vld [vmem:[%s5601_s3 + $0x1d0] sm:$0xff] }
0x1354   :  { %4570 = vmatprep.mubr.msk.f32.mxu0 %vm4924_vm1, %v4925_v29  ;;  %4806 = vmatpush3.bf16.msra.mxu0 %v4805_v45 }
0x1355   :  { %4573 = vmatprep.subr.mxu0 %v4925_v29 }
0x135a   :  { %v2941_v46 = vpop.f32.mrb[44].mxu1 }
0x135b   :  { %v4565_v39 = vpop.f32.mrb[45].mxu1  ;;  %v2945_v40 = vsel %vm431_vm4, %v2941_v46, -inf }
0x135c   :  { %2946 = vmax.xlane.f32.xlu0 %v2945_v40  ;;  %v4896_v40 = vld [vmem:[%s5600_s2 + $0x8] sm:$0xff] }
0x1362   :  { %v4588_v7 = vpop.f32.mrb[46].mxu1 }
0x1363   :  { %v5511_v8 = vadd.f32 %v4588_v7, %v4045_v6  ;;  %v3182_v9 = vpop.f32.mrb[47].mxu1 }
0x1364   :  { %v3183_v32 = vadd.f32 %v4045_v6, %v3182_v9  ;;  %v4079_v6 = vld [vmem:[%s5604_s6] ss:$0 sm:$0xff]  ;;  %s4926_s6 = smov [#allocation2]  }
0x1365   :  { %s3879_s8 = sshll.u32 %s4926_s6, 4  ;;  %s3880_s8 = int_to_ptr.vmem [resolvable:$true] %s3879_s8 }
0x1366   :  { %s4899_s9 = scalar_lea.vmem %s3880_s8, 256  ;;  %p4904_p1 = scmp.lt.s32.totalorder %s3880_s8, %s3880_s8 }
0x1367   :  { %p4900_p0 = scmp.ne.s32.totalorder %s3880_s8, %s4899_s9  ;;  %p4905_p2 = scmp.lt.s32.totalorder %s4899_s9, %s4899_s9 }
0x1369   :  { %p4906_p3 = por %p4905_p2, %p4904_p1 }
0x136b   :  { %p4907_p4 = pnand %p4906_p3, %p4900_p0 }
0x13e9   :  { %v2947_v48 = vpop.xlane.xlu0 %2946 }
0x13ea   :  { %v2948_v49 = vsub.f32 %v2941_v46, %v2947_v48  ;;  %v4061_v46 = vld [vmem:[%s5601_s3 + $0x1d8] sm:$0xff]  ;;  %v4063_v48 = vld [vmem:[%s5602_s4 + $0xe] ss:$0 sm:$0xff] }
0x13eb   :  { %v4827_v39 = vpack.c.bf16 %v4061_v46, %v4060_v37 }
0x13ec   :  { %v2949_v50 = vmul.f32 1.442695, %v2948_v49 }
0x13ee   :  { %4879 = vpow2.f32 %v2949_v50 }
0x13f8   :  { %v4880_v51 = vpop.eup %4879 }
0x13f9   :  { %v2951_v43 = vsel %vm431_vm4, %v4880_v51, 0.0 }
0x13fa   :  { %2952 = vadd.xlane.f32.xlu1 %v2951_v43 }
0x1426   :  { %v2861_v52 = vpop.f32.mrb[36].mxu0 }
0x1427   :  { %v5453_v5 = vadd.f32 %v2861_v52, %v5347_v31  ;;  %v4558_v19 = vpop.f32.mrb[37].mxu0  ;;  %v4049_v31 = vld [vmem:[%s5601_s3 + $0x128] sm:$0xff] }
0x1428   :  { %v4815_v18 = vpack.c.bf16 %v4049_v31, %v4048_v17 }
0x1487   :  { %v2953_v53 = vpop.xlane.xlu1 %2952 }
0x1488   :  { %4881 = vrcp.f32 %v2953_v53 }
0x1492   :  { %v4882_v54 = vpop.eup %4881 }
0x1493   :  { %v2955_v55 = vmul.f32 %v4882_v54, %v4880_v51 }
0x1495   :  { %4571 = vmatmul.mubr.msk.f32.vlgmr.msra.gmra.mrb[38].mxu0 %vm431_vm4, %v2955_v55 }
0x1496   :  { %4574 = vmatpush3.msra.mxu0 %v4029_v35  ;;  %4575 = vmatprep.mubr.msk.f32.mxu0 %vm4924_vm1, %v4925_v29  ;;  %v4059_v35 = vld [vmem:[%s5601_s3 + $0x1c8] sm:$0xff] }
0x1497   :  { %4816 = vmatprep.subr.bf16.mxu0 %v4815_v18  ;;  %v4823_v38 = vpack.c.bf16 %v4059_v35, %v4058_v33 }
0x1499   :  { %4824 = vmatprep.subr.bf16.mxu1 %v4823_v38 }
0x149a   :  { %4826 = vmatpush3.bf16.msra.mxu1 %v4823_v38 }
0x149b   :  { %4828 = vmatprep.subr.bf16.mxu1 %v4827_v39 }
0x149e   :  { %4830 = vmatpush3.bf16.msra.mxu1 %v4827_v39 }
0x149f   :  { %4631 = vmatprep.subr.mxu1 %v4925_v29 }
0x14a1   :  { %4612 = vmatmul.mubr.msk.f32.vlgmr.msra.gmra.mrb[48].mxu1 %vm48_vm0, %v4896_v40 }
0x14a2   :  { %4614 = vmatprep.mubr.msk.f32.mxu1 %vm48_vm0, %v4897_v13  ;;  %4632 = vmatpush3.msra.mxu1 %v4068_v47 }
0x14a3   :  { %4842 = vmatprep.subr.bf16.mxu1 %v4923_v24 }
0x14a5   :  { %4615 = vmatmul.mubr.msk.f32.gmra.mrb[50].mxu1 %vm48_vm0, %v4898_v41 }
0x14a6   :  { %4633 = vmatprep.mubr.msk.f32.mxu1 %vm4924_vm1, %v4925_v29 }
0x1568   :  { %v3025_v0 = vpop.f32.mrb[38].mxu0 }
0x1569   :  { %v4572_v1 = vpop.f32.mrb[39].mxu0  ;;  %4576 = vmatmul.mubr.msk.f32.vlgmr.msra.gmra.mrb[40].mxu0 %vm351_vm2, %v3025_v0 }
0x156a   :  { %4818 = vmatpush3.bf16.msra.mxu0 %v4815_v18  ;;  %4597 = vmatprep.mubr.msk.f32.mxu0 %vm48_vm0, %v4892_v2 }
0x156b   :  { %4820 = vmatprep.subr.bf16.mxu0 %v4819_v34 }
0x156e   :  { %4822 = vmatpush3.bf16.msra.mxu0 %v4819_v34 }
0x156f   :  { %4831 = vmatprep.subr.bf16.mxu0 %v4923_v24 }
0x1571   :  { %4598 = vmatmul.mubr.msk.f32.vlgmr.msra.gmra.mrb[42].mxu0 %vm48_vm0, %v4893_v25 }
0x1572   :  { %4600 = vmatprep.mubr.msk.f32.mxu0 %vm48_vm0, %v4894_v3 }
0x1574   :  { %v4613_v49 = vpop.f32.mrb[48].mxu1 }
0x1575   :  { %4601 = vmatmul.mubr.msk.f32.gmra.mrb[44].mxu0 %vm48_vm0, %v4895_v4  ;;  %v3374_v50 = vadd.f32 %v4613_v49, %v4063_v48  ;;  %v3368_v51 = vpop.f32.mrb[49].mxu1 }
0x1576   :  { %4621 = vmatprep.mubr.msk.f32.mxu0 %vm4924_vm1, %v4925_v29  ;;  %v3369_v43 = vadd.f32 %v4063_v48, %v3368_v51 }
0x1578   :  { %v4836_v52 = vpack.c.bf16 %v3374_v50, %v3369_v43  ;;  %v4616_v61 = vpop.f32.mrb[50].mxu1 }
0x1579   :  { %v3384_v62 = vadd.f32 %v4616_v61, %v4063_v48  ;;  %v3378_v63 = vpop.f32.mrb[51].mxu1 }
0x157a   :  { %v3379_v34 = vadd.f32 %v4063_v48, %v3378_v63 }
0x157c   :  { %v4843_v0 = vpack.c.bf16 %v3384_v62, %v3379_v34 }
0x163c   :  { %v3098_v10 = vpop.f32.mrb[40].mxu0 }
0x163d   :  { %v5514_v11 = vadd.f32 %v3098_v10, %v5396_v56  ;;  %v4577_v12 = vpop.f32.mrb[41].mxu0 }
0x1644   :  { %v4599_v14 = vpop.f32.mrb[42].mxu0 }
0x1645   :  { %v3276_v15 = vadd.f32 %v4599_v14, %v4053_v26  ;;  %v3270_v27 = vpop.f32.mrb[43].mxu0 }
0x1646   :  { %v3271_v28 = vadd.f32 %v4053_v26, %v3270_v27 }
0x1648   :  { %v4832_v16 = vpack.c.bf16 %v3276_v15, %v3271_v28  ;;  %v4602_v21 = vpop.f32.mrb[44].mxu0 }
0x1649   :  { %v3286_v22 = vadd.f32 %v4602_v21, %v4053_v26  ;;  %v3280_v23 = vpop.f32.mrb[45].mxu0 }
0x164a   :  { %4834 = vmatpush3.bf16.xpose.msk.msra.mxu0 %vm5086_vm3, %v4832_v16  ;;  %v3281_v30 = vadd.f32 %v4053_v26, %v3280_v23 }
0x164b   :  { %4835 = vmatprep.subr.bf16.mxu0 %v4923_v24 }
0x164c   :  { %v4839_v56 = vpack.c.bf16 %v3286_v22, %v3281_v30 }
0x1651   :  { %4622 = vmatmul.mubr.msk.f32.vlgmr.msra.gmra.mrb[46].mxu0 %vm351_vm2, %v3183_v32 }
0x1652   :  { %4628 = vmatprep.mubr.msk.f32.mxu0 %vm4924_vm1, %v4925_v29  ;;  %4837 = vmatpush3.bf16.msra.mxu0 %v4836_v52 }
0x1653   :  { %4838 = vmatprep.subr.bf16.mxu0 %v4923_v24 }
0x1724   :  { %v3464_v42 = vpop.f32.mrb[46].mxu0 }
0x1725   :  { %v4623_v44 = vpop.f32.mrb[47].mxu0  ;;  %v3468_v45 = vsel %vm431_vm4, %v3464_v42, -inf }
0x1726   :  { %3469 = vmax.xlane.f32.xlu0 %v3468_v45 }
0x17b3   :  { %v3470_v19 = vpop.xlane.xlu0 %3469 }
0x17b4   :  { %v3471_v53 = vsub.f32 %v3464_v42, %v3470_v19 }
0x17b6   :  { %v3472_v54 = vmul.f32 1.442695, %v3471_v53 }
0x17b8   :  { %4883 = vpow2.f32 %v3472_v54 }
0x17c2   :  { %v4884_v55 = vpop.eup %4883 }
0x17c3   :  { %v3474_v17 = vsel %vm431_vm4, %v4884_v55, 0.0 }
0x17c4   :  { %3475 = vadd.xlane.f32.xlu1 %v3474_v17 }
0x1851   :  { %v3476_v31 = vpop.xlane.xlu1 %3475 }
0x1852   :  { %4885 = vrcp.f32 %v3476_v31 }
0x185c   :  { %v4886_v18 = vpop.eup %4885 }
0x185d   :  { %v3478_v20 = vmul.f32 %v4886_v18, %v4884_v55 }
0x185f   :  { %4629 = vmatmul.mubr.msk.f32.vlgmr.msra.gmra.mrb[48].mxu0 %vm431_vm4, %v3478_v20 }
0x1860   :  { %4841 = vmatpush3.bf16.xpose.msk.msra.mxu0 %vm5086_vm3, %v4839_v56  ;;  %4640 = vmatprep.mubr.msk.f32.mxu0 %vm4924_vm1, %v4925_v29 }
0x1867   :  { %4641 = vmatmul.mubr.msk.f32.vlgmr.msra.gmra.mrb[50].mxu0 %vm351_vm2, %v5511_v8 }
0x1932   :  { %v3548_v57 = vpop.f32.mrb[48].mxu0 }
0x1933   :  { %v4630_v58 = vpop.f32.mrb[49].mxu0  ;;  %4634 = vmatmul.mubr.msk.f32.vlgmr.msra.gmra.mrb[52].mxu1 %vm351_vm2, %v3548_v57 }
0x1934   :  { %4647 = vmatprep.mubr.msk.f32.mxu1 %vm4924_vm1, %v4925_v29  ;;  %4844 = vmatpush3.bf16.msra.mxu1 %v4843_v0 }
0x1935   :  { %4650 = vmatprep.subr.mxu1 %v4925_v29 }
0x193a   :  { %v3701_v36 = vpop.f32.mrb[50].mxu0 }
0x193b   :  { %v4642_v59 = vpop.f32.mrb[51].mxu0  ;;  %v3705_v60 = vsel %vm431_vm4, %v3701_v36, -inf }
0x193c   :  { %3706 = vmax.xlane.f32.xlu0 %v3705_v60 }
0x19c9   :  { %v3707_v24 = vpop.xlane.xlu0 %3706 }
0x19ca   :  { %v3708_v1 = vsub.f32 %v3701_v36, %v3707_v24 }
0x19cc   :  { %v3709_v2 = vmul.f32 1.442695, %v3708_v1 }
0x19ce   :  { %4887 = vpow2.f32 %v3709_v2 }
0x19d8   :  { %v4888_v25 = vpop.eup %4887 }
0x19d9   :  { %v3711_v3 = vsel %vm431_vm4, %v4888_v25, 0.0 }
0x19da   :  { %3712 = vadd.xlane.f32.xlu1 %v3711_v3 }
0x1a06   :  { %v3621_v4 = vpop.f32.mrb[52].mxu1 }
0x1a07   :  { %v3625_v7 = vadd.f32 %v3621_v4, %v5453_v5  ;;  %v4635_v8 = vpop.f32.mrb[53].mxu1 }
0x1a09   :  { %v3870_v9 = vadd.f32 %v4079_v6, %v3625_v7 }
0x1a0b   :  { %3871 = vst.msk [vmem:[#allocation2] sm:$0xff] %vm48_vm0, %v3870_v9 }
0x1a67   :  { %v3713_v10 = vpop.xlane.xlu1 %3712 }
0x1a68   :  { %4889 = vrcp.f32 %v3713_v10 }
0x1a72   :  { %v4890_v12 = vpop.eup %4889 }
0x1a73   :  { %v3715_v26 = vmul.f32 %v4890_v12, %v4888_v25 }
0x1a75   :  { %4648 = vmatmul.mubr.msk.f32.vlgmr.msra.gmra.mrb[54].mxu1 %vm431_vm4, %v3715_v26 }
0x1a76   :  { %4651 = vmatpush3.msra.mxu1 %v4068_v47  ;;  %4652 = vmatprep.mubr.msk.f32.mxu1 %vm4924_vm1, %v4925_v29 }
0x1b48   :  { %v3785_v14 = vpop.f32.mrb[54].mxu1 }
0x1b49   :  { %v4649_v15 = vpop.f32.mrb[55].mxu1  ;;  %4653 = vmatmul.mubr.msk.f32.vlgmr.msra.gmra.mrb[56].mxu1 %vm351_vm2, %v3785_v14 }
0x1c1c   :  { %v3858_v5 = vpop.f32.mrb[56].mxu1 }
0x1c1d   :  { %v3862_v27 = vadd.f32 %v3858_v5, %v5514_v11  ;;  %v4654_v28 = vpop.f32.mrb[57].mxu1 }
0x1c1f   :  { %v3872_v16 = vadd.f32 %v4079_v6, %v3862_v27 }
0x1c21   :  { %3873 = vst.msk [vmem:[#allocation2 + $0x8] sm:$0xff] %vm48_vm0, %v3872_v16 }
0x1c22   :  { %4910 = shalt.err (!%p4907_p4)
}
0x1c23   :  { %s4911_s12 = scalar_lea.hbm %s5605_s7, 256 }
0x1c24   :  { %p4912_p5 = scmp.ne.s32.totalorder %s5605_s7, %s4911_s12  ;;  %p4915_p6 = scmp.lt.u32.totalorder %s4911_s12, %s5605_s7 }
0x1c26   :  { %p4917_p7 = pnand %p4915_p6, %p4912_p5 }
0x1c28   :  { %4920 = shalt.err (!%p4917_p7)
}
0x1c29   :  { %s4927_s16 = smov 128   ;;  %s4928_s17 = smov 8  }
0x1c2a   :  { %3885 = dma.vmem_to_hbm [thread:$0]  %s3880_s8, 256, %s5605_s7, [#allocation3], %s4927_s16, %s4927_s16, %s4928_s17  }
0x1c2b   :  { %4921 = dma.done.wait [#allocation3], 256  }
0x1c2c   :  { %4922 = vsyncadd [#allocation3], 4294967040 }
0x1c2d   :  { %3889 = vsyncpa [#allocation3], 1 }

</bundles_post_ra>
